<compile_context>
chip_gen: v7x
topology: tpu7x:2x2x1
jax: 0.10.0
libtpu: 0.0.40
codegen_flags: <defaults>
</compile_context>

<pallas_src>
import functools

import jax
import jax.numpy as jnp
from jax import lax
from jax.experimental import pallas as pl
from jax.experimental.pallas import tpu as pltpu


def _make_kernel(batch, seq, embed_dim, num_filters, filter_size, hidden_dim, tagset):
    pad = filter_size // 2
    B, S, E, F, K, H, T = batch, seq, embed_dim, num_filters, filter_size, hidden_dim, tagset

    def kernel(ids_ref, table_ref, wc_ref, bc_ref, wih_ref, whh_ref,
               blstm_ref, wlin_ref, blin_ref, out_ref, emb_scr):
        f32 = jnp.float32

        # ---- fused embedding gather + conv zero-padding (t-major) -----------
        # emb_scr row (s+pad)*B + b  <-  table[ids[b, s]];  pad rows stay 0.
        emb_scr[...] = jnp.zeros_like(emb_scr)
        for s in range(S):
            for b in range(B):
                tok = ids_ref[b, s]                                 # SMEM scalar
                r = (s + pad) * B + b
                emb_scr[r:r + 1, :] = table_ref[pl.ds(tok, 1), :]
        emb_pad = emb_scr[...]                                      # ((S+2p)*B, E)

        # ---- Conv1d + ReLU + AvgPool(F): im2col -> one MXU matmul -----------
        # t-major layout makes every tap a contiguous leading-axis slab.
        taps = [emb_pad[k * B:(k + S) * B, :] for k in range(K)]    # K x (S*B, E)
        cols = jnp.concatenate(taps, axis=1)                        # (S*B, K*E)
        conv = jnp.dot(cols, wc_ref[...], preferred_element_type=f32) + bc_ref[...]
        cnn_gate = jnp.mean(jnp.maximum(conv, 0.0), axis=1, keepdims=True)  # (S*B, 1)

        # ---- LSTM input projection hoisted out of the recurrence ------------
        emb_tm = taps[pad]                                          # (S*B, E) unpadded
        gates_x = (jnp.dot(emb_tm, wih_ref[...], preferred_element_type=f32)
                   + blstm_ref[...])                                # (S*B, 4H) t-major

        whh = whh_ref[...]                                          # (H, 4H)
        wlin = wlin_ref[...]                                        # (S, T)

        # Hoisted lane mask: torch gate order (i, f, g, o) -> tanh on g block.
        lane = lax.broadcasted_iota(jnp.int32, (B, 4 * H), 1)
        g_mask = (lane >= 2 * H) & (lane < 3 * H)

        # ---- recurrence (serial) + rank-1 logit accumulation ----------------
        # TODO(synk): resident whh via pltpu.matmul_push_rhs/_acc_lhs/_pop.
        # TODO(synk): switch to lax.fori_loop with (h, c, y) carry if S > ~16.
        h = jnp.zeros((B, H), f32)
        c = jnp.zeros((B, H), f32)
        y = jnp.zeros((B, T), f32) + blin_ref[...]                  # start at bias
        for t in range(S):
            gates = gates_x[t * B:(t + 1) * B, :] + jnp.dot(
                h, whh, preferred_element_type=f32)                 # (B, 4H)
            # Full-vreg activations blended with the hoisted lane mask
            # (EUP has slack; avoids lane-offset activation slicing).
            act = jnp.where(g_mask, jnp.tanh(gates), jax.nn.sigmoid(gates))
            i_g = act[:, 0:H]
            f_g = act[:, H:2 * H]
            g_g = act[:, 2 * H:3 * H]
            o_g = act[:, 3 * H:4 * H]
            c = f_g * c + i_g * g_g
            h = o_g * jnp.tanh(c)
            # logits rank-1 update: y += (gate_t * sum_H h_t) * wlin[t, :]
            s_t = jnp.sum(h, axis=1, keepdims=True) * cnn_gate[t * B:(t + 1) * B, :]
            y = y + s_t * wlin[t:t + 1, :]

        # ---- softmax(dim=1) --------------------------------------------------
        y = y - jnp.max(y, axis=1, keepdims=True)
        ey = jnp.exp(y)
        out_ref[...] = ey / jnp.sum(ey, axis=1, keepdims=True)

    return kernel


def pack_params(params):
    """One-time weight re-layout into the kernel's packed format.

    Call this ONCE; the per-forward wrapper then launches only the Pallas call
    (no per-call transposes / permutes / reshapes).
    """
    F, E, K = params["conv_w"].shape
    H = params["w_hh"].shape[1]
    T, S = params["w_lin"].shape
    assert K % 2 == 1, "filter_size must be odd (matches the torch model's shapes)"
    return {
        "table": params["embedding"].astype(jnp.float32),                     # (V, E)
        "wc":    jnp.transpose(params["conv_w"], (2, 1, 0)).reshape(K * E, F),  # im2col
        "bc":    params["conv_b"].reshape(1, F),
        "wih":   params["w_ih"].T,                                            # (E, 4H) i,f,g,o
        "whh":   params["w_hh"].T,                                            # (H, 4H)
        "blstm": (params["b_ih"] + params["b_hh"]).reshape(1, 4 * H),
        "wlin":  params["w_lin"].T,                                           # (S, T)
        "blin":  params["b_lin"].reshape(1, T),
    }


def my_model_forward(x_ids, packed):
    """x_ids: int32 (batch, max_sent_len); packed: pack_params(...) output."""
    B, S = x_ids.shape
    V, E = packed["table"].shape
    F = packed["bc"].shape[1]
    K = packed["wc"].shape[0] // E
    H = packed["whh"].shape[0]
    T = packed["blin"].shape[1]
    pad = K // 2

    kernel = _make_kernel(B, S, E, F, K, H, T)

    smem = pl.BlockSpec(memory_space=pltpu.MemorySpace.SMEM)
    vmem = pl.BlockSpec(memory_space=pltpu.MemorySpace.VMEM)
    fwd = pl.pallas_call(
        kernel,
        out_shape=jax.ShapeDtypeStruct((B, T), jnp.float32),
        in_specs=[smem] + [vmem] * 8,
        out_specs=vmem,
        scratch_shapes=[pltpu.VMEM(((S + 2 * pad) * B, E), jnp.float32)],
    )
    return fwd(x_ids, packed["table"], packed["wc"], packed["bc"],
               packed["wih"], packed["whh"], packed["blstm"],
               packed["wlin"], packed["blin"])


def reference_forward(x_ids, params):
    """Pure-JAX reference mirroring the PyTorch forward exactly."""
    emb = jnp.take(params["embedding"], x_ids, axis=0)            # (B, S, E)
    B, S, _ = emb.shape
    K = params["conv_w"].shape[2]
    H = params["w_hh"].shape[1]
    pad = K // 2

    xp = jnp.pad(emb, ((0, 0), (pad, pad), (0, 0)))
    conv = jnp.zeros((B, S, params["conv_w"].shape[0]), jnp.float32) + params["conv_b"]
    for k in range(K):
        conv = conv + jnp.einsum('bse,fe->bsf', xp[:, k:k + S, :],
                                 params["conv_w"][:, :, k])
    cnn_out = jax.nn.relu(conv)
    cnn_gate = jnp.mean(cnn_out, axis=2)                          # AvgPool1d(F) (B, S)

    wih, whh = params["w_ih"], params["w_hh"]
    b = params["b_ih"] + params["b_hh"]
    h = jnp.zeros((B, H), jnp.float32)
    c = jnp.zeros((B, H), jnp.float32)
    outs = []
    for t in range(S):
        g = emb[:, t, :] @ wih.T + h @ whh.T + b
        i = jax.nn.sigmoid(g[:, 0:H])
        f = jax.nn.sigmoid(g[:, H:2 * H])
        gg = jnp.tanh(g[:, 2 * H:3 * H])
        o = jax.nn.sigmoid(g[:, 3 * H:4 * H])
        c = f * c + i * gg
        h = o * jnp.tanh(c)
        outs.append(h)
    lstm_out = jnp.stack(outs, axis=1)                            # (B, S, H)
    in_sum = jnp.sum(lstm_out * cnn_gate[:, :, None], axis=2)     # (B, S)
    y = in_sum @ params["w_lin"].T + params["b_lin"]
    return jax.nn.softmax(y, axis=1)


def init_params(key, vocab_size, embed_dim, num_filters, filter_size,
                hidden_dim, max_sent_len, tagset):
    ks = jax.random.split(key, 9)
    scale = 0.1
    emb = jax.random.normal(ks[0], (vocab_size, embed_dim), jnp.float32) * scale
    emb = emb.at[0].set(0.0)                                      # padding_idx=0
    return {
        "embedding": emb,
        "conv_w": jax.random.normal(ks[1], (num_filters, embed_dim, filter_size), jnp.float32) * scale,
        "conv_b": jax.random.normal(ks[2], (num_filters,), jnp.float32) * scale,
        "w_ih":   jax.random.normal(ks[3], (4 * hidden_dim, embed_dim), jnp.float32) * scale,
        "w_hh":   jax.random.normal(ks[4], (4 * hidden_dim, hidden_dim), jnp.float32) * scale,
        "b_ih":   jax.random.normal(ks[5], (4 * hidden_dim,), jnp.float32) * scale,
        "b_hh":   jax.random.normal(ks[6], (4 * hidden_dim,), jnp.float32) * scale,
        "w_lin":  jax.random.normal(ks[7], (tagset, max_sent_len), jnp.float32) * scale,
        "b_lin":  jax.random.normal(ks[8], (tagset,), jnp.float32) * scale,
    }


if __name__ == "__main__":
    # small shapes consistent with the module
    batch, max_sent_len = 2, 8
    embed_dim, num_filters, filter_size = 16, 8, 3
    hidden_dim, vocab_size, tagset = 32, 20, 4

    key = jax.random.PRNGKey(0)
    k_param, k_data = jax.random.split(key)
    params = init_params(k_param, vocab_size, embed_dim, num_filters,
                         filter_size, hidden_dim, max_sent_len, tagset)
    x_ids = jax.random.randint(k_data, (batch, max_sent_len), 0, vocab_size,
                               dtype=jnp.int32)

    packed = pack_params(params)          # one-time weight re-layout (not per call)
    packed = jax.tree_util.tree_map(jax.block_until_ready, packed)

    probs = jax.jit(my_model_forward)(x_ids, packed)
    probs = jax.block_until_ready(probs)

    ref = reference_forward(x_ids, params)

    assert probs.shape == (batch, tagset)
    assert bool(jnp.all(jnp.isfinite(probs)))
    assert bool(jnp.allclose(jnp.sum(probs, axis=1), 1.0, atol=1e-5))
    assert bool(jnp.allclose(probs, ref, atol=1e-5, rtol=1e-4))
    print("KERNEL_OK")
</pallas_src>

<mosaic_0001>
module attributes {stable_mosaic.version = 11 : i64} {
  func.func @kernel(%arg0: memref<2x8xi32, #tpu.memory_space<smem>>, %arg1: memref<20x16xf32, #tpu.memory_space<vmem>>, %arg2: memref<48x8xf32, #tpu.memory_space<vmem>>, %arg3: memref<1x8xf32, #tpu.memory_space<vmem>>, %arg4: memref<16x128xf32, #tpu.memory_space<vmem>>, %arg5: memref<32x128xf32, #tpu.memory_space<vmem>>, %arg6: memref<1x128xf32, #tpu.memory_space<vmem>>, %arg7: memref<8x4xf32, #tpu.memory_space<vmem>>, %arg8: memref<1x4xf32, #tpu.memory_space<vmem>>, %arg9: memref<2x4xf32, #tpu.memory_space<vmem>>, %arg10: memref<20x16xf32, #tpu.memory_space<vmem>>) attributes {dimension_semantics = [], scalar_prefetch = 0 : i64, scratch_operands = 1 : i64, tpu.core_type = #tpu.core_type<tc>} {
    %cst = arith.constant 0.000000e+00 : f32
    %0 = vector.broadcast %cst : f32 to vector<20x16xf32>
    %c0 = arith.constant 0 : index
    %c0_0 = arith.constant 0 : index
    %1 = vector.load %arg10[%c0, %c0_0] : memref<20x16xf32, #tpu.memory_space<vmem>>, vector<20x16xf32>
    tpu.vector_store %arg10[%c0, %c0_0], %0 {strides = array<i32>} : memref<20x16xf32, #tpu.memory_space<vmem>>, vector<20x16xf32>,
    %c0_1 = arith.constant 0 : index
    %c0_2 = arith.constant 0 : index
    %2 = memref.load %arg0[%c0_1, %c0_2] : memref<2x8xi32, #tpu.memory_space<smem>>
    %3 = arith.index_cast %2 : i32 to index
    %c0_3 = arith.constant 0 : index
    %4 = vector.load %arg1[%3, %c0_3] : memref<20x16xf32, #tpu.memory_space<vmem>>, vector<1x16xf32>
    %c2 = arith.constant 2 : index
    %c0_4 = arith.constant 0 : index
    %5 = vector.load %arg10[%c2, %c0_4] : memref<20x16xf32, #tpu.memory_space<vmem>>, vector<1x16xf32>
    tpu.vector_store %arg10[%c2, %c0_4], %4 {strides = array<i32>} : memref<20x16xf32, #tpu.memory_space<vmem>>, vector<1x16xf32>,
    %c1 = arith.constant 1 : index
    %c0_5 = arith.constant 0 : index
    %6 = memref.load %arg0[%c1, %c0_5] : memref<2x8xi32, #tpu.memory_space<smem>>
    %7 = arith.index_cast %6 : i32 to index
    %c0_6 = arith.constant 0 : index
    %8 = vector.load %arg1[%7, %c0_6] : memref<20x16xf32, #tpu.memory_space<vmem>>, vector<1x16xf32>
    %c3 = arith.constant 3 : index
    %c0_7 = arith.constant 0 : index
    %9 = vector.load %arg10[%c3, %c0_7] : memref<20x16xf32, #tpu.memory_space<vmem>>, vector<1x16xf32>
    tpu.vector_store %arg10[%c3, %c0_7], %8 {strides = array<i32>} : memref<20x16xf32, #tpu.memory_space<vmem>>, vector<1x16xf32>,
    %c0_8 = arith.constant 0 : index
    %c1_9 = arith.constant 1 : index
    %10 = memref.load %arg0[%c0_8, %c1_9] : memref<2x8xi32, #tpu.memory_space<smem>>
    %11 = arith.index_cast %10 : i32 to index
    %c0_10 = arith.constant 0 : index
    %12 = vector.load %arg1[%11, %c0_10] : memref<20x16xf32, #tpu.memory_space<vmem>>, vector<1x16xf32>
    %c4 = arith.constant 4 : index
    %c0_11 = arith.constant 0 : index
    %13 = vector.load %arg10[%c4, %c0_11] : memref<20x16xf32, #tpu.memory_space<vmem>>, vector<1x16xf32>
    tpu.vector_store %arg10[%c4, %c0_11], %12 {strides = array<i32>} : memref<20x16xf32, #tpu.memory_space<vmem>>, vector<1x16xf32>,
    %c1_12 = arith.constant 1 : index
    %c1_13 = arith.constant 1 : index
    %14 = memref.load %arg0[%c1_12, %c1_13] : memref<2x8xi32, #tpu.memory_space<smem>>
    %15 = arith.index_cast %14 : i32 to index
    %c0_14 = arith.constant 0 : index
    %16 = vector.load %arg1[%15, %c0_14] : memref<20x16xf32, #tpu.memory_space<vmem>>, vector<1x16xf32>
    %c5 = arith.constant 5 : index
    %c0_15 = arith.constant 0 : index
    %17 = vector.load %arg10[%c5, %c0_15] : memref<20x16xf32, #tpu.memory_space<vmem>>, vector<1x16xf32>
    tpu.vector_store %arg10[%c5, %c0_15], %16 {strides = array<i32>} : memref<20x16xf32, #tpu.memory_space<vmem>>, vector<1x16xf32>,
    %c0_16 = arith.constant 0 : index
    %c2_17 = arith.constant 2 : index
    %18 = memref.load %arg0[%c0_16, %c2_17] : memref<2x8xi32, #tpu.memory_space<smem>>
    %19 = arith.index_cast %18 : i32 to index
    %c0_18 = arith.constant 0 : index
    %20 = vector.load %arg1[%19, %c0_18] : memref<20x16xf32, #tpu.memory_space<vmem>>, vector<1x16xf32>
    %c6 = arith.constant 6 : index
    %c0_19 = arith.constant 0 : index
    %21 = vector.load %arg10[%c6, %c0_19] : memref<20x16xf32, #tpu.memory_space<vmem>>, vector<1x16xf32>
    tpu.vector_store %arg10[%c6, %c0_19], %20 {strides = array<i32>} : memref<20x16xf32, #tpu.memory_space<vmem>>, vector<1x16xf32>,
    %c1_20 = arith.constant 1 : index
    %c2_21 = arith.constant 2 : index
    %22 = memref.load %arg0[%c1_20, %c2_21] : memref<2x8xi32, #tpu.memory_space<smem>>
    %23 = arith.index_cast %22 : i32 to index
    %c0_22 = arith.constant 0 : index
    %24 = vector.load %arg1[%23, %c0_22] : memref<20x16xf32, #tpu.memory_space<vmem>>, vector<1x16xf32>
    %c7 = arith.constant 7 : index
    %c0_23 = arith.constant 0 : index
    %25 = vector.load %arg10[%c7, %c0_23] : memref<20x16xf32, #tpu.memory_space<vmem>>, vector<1x16xf32>
    tpu.vector_store %arg10[%c7, %c0_23], %24 {strides = array<i32>} : memref<20x16xf32, #tpu.memory_space<vmem>>, vector<1x16xf32>,
    %c0_24 = arith.constant 0 : index
    %c3_25 = arith.constant 3 : index
    %26 = memref.load %arg0[%c0_24, %c3_25] : memref<2x8xi32, #tpu.memory_space<smem>>
    %27 = arith.index_cast %26 : i32 to index
    %c0_26 = arith.constant 0 : index
    %28 = vector.load %arg1[%27, %c0_26] : memref<20x16xf32, #tpu.memory_space<vmem>>, vector<1x16xf32>
    %c8 = arith.constant 8 : index
    %c0_27 = arith.constant 0 : index
    %29 = vector.load %arg10[%c8, %c0_27] : memref<20x16xf32, #tpu.memory_space<vmem>>, vector<1x16xf32>
    tpu.vector_store %arg10[%c8, %c0_27], %28 {strides = array<i32>} : memref<20x16xf32, #tpu.memory_space<vmem>>, vector<1x16xf32>,
    %c1_28 = arith.constant 1 : index
    %c3_29 = arith.constant 3 : index
    %30 = memref.load %arg0[%c1_28, %c3_29] : memref<2x8xi32, #tpu.memory_space<smem>>
    %31 = arith.index_cast %30 : i32 to index
    %c0_30 = arith.constant 0 : index
    %32 = vector.load %arg1[%31, %c0_30] : memref<20x16xf32, #tpu.memory_space<vmem>>, vector<1x16xf32>
    %c9 = arith.constant 9 : index
    %c0_31 = arith.constant 0 : index
    %33 = vector.load %arg10[%c9, %c0_31] : memref<20x16xf32, #tpu.memory_space<vmem>>, vector<1x16xf32>
    tpu.vector_store %arg10[%c9, %c0_31], %32 {strides = array<i32>} : memref<20x16xf32, #tpu.memory_space<vmem>>, vector<1x16xf32>,
    %c0_32 = arith.constant 0 : index
    %c4_33 = arith.constant 4 : index
    %34 = memref.load %arg0[%c0_32, %c4_33] : memref<2x8xi32, #tpu.memory_space<smem>>
    %35 = arith.index_cast %34 : i32 to index
    %c0_34 = arith.constant 0 : index
    %36 = vector.load %arg1[%35, %c0_34] : memref<20x16xf32, #tpu.memory_space<vmem>>, vector<1x16xf32>
    %c10 = arith.constant 10 : index
    %c0_35 = arith.constant 0 : index
    %37 = vector.load %arg10[%c10, %c0_35] : memref<20x16xf32, #tpu.memory_space<vmem>>, vector<1x16xf32>
    tpu.vector_store %arg10[%c10, %c0_35], %36 {strides = array<i32>} : memref<20x16xf32, #tpu.memory_space<vmem>>, vector<1x16xf32>,
    %c1_36 = arith.constant 1 : index
    %c4_37 = arith.constant 4 : index
    %38 = memref.load %arg0[%c1_36, %c4_37] : memref<2x8xi32, #tpu.memory_space<smem>>
    %39 = arith.index_cast %38 : i32 to index
    %c0_38 = arith.constant 0 : index
    %40 = vector.load %arg1[%39, %c0_38] : memref<20x16xf32, #tpu.memory_space<vmem>>, vector<1x16xf32>
    %c11 = arith.constant 11 : index
    %c0_39 = arith.constant 0 : index
    %41 = vector.load %arg10[%c11, %c0_39] : memref<20x16xf32, #tpu.memory_space<vmem>>, vector<1x16xf32>
    tpu.vector_store %arg10[%c11, %c0_39], %40 {strides = array<i32>} : memref<20x16xf32, #tpu.memory_space<vmem>>, vector<1x16xf32>,
    %c0_40 = arith.constant 0 : index
    %c5_41 = arith.constant 5 : index
    %42 = memref.load %arg0[%c0_40, %c5_41] : memref<2x8xi32, #tpu.memory_space<smem>>
    %43 = arith.index_cast %42 : i32 to index
    %c0_42 = arith.constant 0 : index
    %44 = vector.load %arg1[%43, %c0_42] : memref<20x16xf32, #tpu.memory_space<vmem>>, vector<1x16xf32>
    %c12 = arith.constant 12 : index
    %c0_43 = arith.constant 0 : index
    %45 = vector.load %arg10[%c12, %c0_43] : memref<20x16xf32, #tpu.memory_space<vmem>>, vector<1x16xf32>
    tpu.vector_store %arg10[%c12, %c0_43], %44 {strides = array<i32>} : memref<20x16xf32, #tpu.memory_space<vmem>>, vector<1x16xf32>,
    %c1_44 = arith.constant 1 : index
    %c5_45 = arith.constant 5 : index
    %46 = memref.load %arg0[%c1_44, %c5_45] : memref<2x8xi32, #tpu.memory_space<smem>>
    %47 = arith.index_cast %46 : i32 to index
    %c0_46 = arith.constant 0 : index
    %48 = vector.load %arg1[%47, %c0_46] : memref<20x16xf32, #tpu.memory_space<vmem>>, vector<1x16xf32>
    %c13 = arith.constant 13 : index
    %c0_47 = arith.constant 0 : index
    %49 = vector.load %arg10[%c13, %c0_47] : memref<20x16xf32, #tpu.memory_space<vmem>>, vector<1x16xf32>
    tpu.vector_store %arg10[%c13, %c0_47], %48 {strides = array<i32>} : memref<20x16xf32, #tpu.memory_space<vmem>>, vector<1x16xf32>,
    %c0_48 = arith.constant 0 : index
    %c6_49 = arith.constant 6 : index
    %50 = memref.load %arg0[%c0_48, %c6_49] : memref<2x8xi32, #tpu.memory_space<smem>>
    %51 = arith.index_cast %50 : i32 to index
    %c0_50 = arith.constant 0 : index
    %52 = vector.load %arg1[%51, %c0_50] : memref<20x16xf32, #tpu.memory_space<vmem>>, vector<1x16xf32>
    %c14 = arith.constant 14 : index
    %c0_51 = arith.constant 0 : index
    %53 = vector.load %arg10[%c14, %c0_51] : memref<20x16xf32, #tpu.memory_space<vmem>>, vector<1x16xf32>
    tpu.vector_store %arg10[%c14, %c0_51], %52 {strides = array<i32>} : memref<20x16xf32, #tpu.memory_space<vmem>>, vector<1x16xf32>,
    %c1_52 = arith.constant 1 : index
    %c6_53 = arith.constant 6 : index
    %54 = memref.load %arg0[%c1_52, %c6_53] : memref<2x8xi32, #tpu.memory_space<smem>>
    %55 = arith.index_cast %54 : i32 to index
    %c0_54 = arith.constant 0 : index
    %56 = vector.load %arg1[%55, %c0_54] : memref<20x16xf32, #tpu.memory_space<vmem>>, vector<1x16xf32>
    %c15 = arith.constant 15 : index
    %c0_55 = arith.constant 0 : index
    %57 = vector.load %arg10[%c15, %c0_55] : memref<20x16xf32, #tpu.memory_space<vmem>>, vector<1x16xf32>
    tpu.vector_store %arg10[%c15, %c0_55], %56 {strides = array<i32>} : memref<20x16xf32, #tpu.memory_space<vmem>>, vector<1x16xf32>,
    %c0_56 = arith.constant 0 : index
    %c7_57 = arith.constant 7 : index
    %58 = memref.load %arg0[%c0_56, %c7_57] : memref<2x8xi32, #tpu.memory_space<smem>>
    %59 = arith.index_cast %58 : i32 to index
    %c0_58 = arith.constant 0 : index
    %60 = vector.load %arg1[%59, %c0_58] : memref<20x16xf32, #tpu.memory_space<vmem>>, vector<1x16xf32>
    %c16 = arith.constant 16 : index
    %c0_59 = arith.constant 0 : index
    %61 = vector.load %arg10[%c16, %c0_59] : memref<20x16xf32, #tpu.memory_space<vmem>>, vector<1x16xf32>
    tpu.vector_store %arg10[%c16, %c0_59], %60 {strides = array<i32>} : memref<20x16xf32, #tpu.memory_space<vmem>>, vector<1x16xf32>,
    %c1_60 = arith.constant 1 : index
    %c7_61 = arith.constant 7 : index
    %62 = memref.load %arg0[%c1_60, %c7_61] : memref<2x8xi32, #tpu.memory_space<smem>>
    %63 = arith.index_cast %62 : i32 to index
    %c0_62 = arith.constant 0 : index
    %64 = vector.load %arg1[%63, %c0_62] : memref<20x16xf32, #tpu.memory_space<vmem>>, vector<1x16xf32>
    %c17 = arith.constant 17 : index
    %c0_63 = arith.constant 0 : index
    %65 = vector.load %arg10[%c17, %c0_63] : memref<20x16xf32, #tpu.memory_space<vmem>>, vector<1x16xf32>
    tpu.vector_store %arg10[%c17, %c0_63], %64 {strides = array<i32>} : memref<20x16xf32, #tpu.memory_space<vmem>>, vector<1x16xf32>,
    %c0_64 = arith.constant 0 : index
    %c0_65 = arith.constant 0 : index
    %66 = vector.load %arg10[%c0_64, %c0_65] : memref<20x16xf32, #tpu.memory_space<vmem>>, vector<20x16xf32>
    %67 = vector.extract_strided_slice %66 {offsets = [0, 0], sizes = [16, 16], strides = [1, 1]} : vector<20x16xf32> to vector<16x16xf32>
    %68 = vector.extract_strided_slice %66 {offsets = [2, 0], sizes = [16, 16], strides = [1, 1]} : vector<20x16xf32> to vector<16x16xf32>
    %69 = vector.extract_strided_slice %66 {offsets = [4, 0], sizes = [16, 16], strides = [1, 1]} : vector<20x16xf32> to vector<16x16xf32>
    %70 = tpu.concatenate %67, %68, %69 in 1 : vector<16x16xf32>, vector<16x16xf32>, vector<16x16xf32> -> vector<16x48xf32>
    %c0_66 = arith.constant 0 : index
    %c0_67 = arith.constant 0 : index
    %71 = vector.load %arg2[%c0_66, %c0_67] : memref<48x8xf32, #tpu.memory_space<vmem>>, vector<48x8xf32>
    %cst_68 = arith.constant dense<0.000000e+00> : vector<16x8xf32>
    %72 = tpu.matmul %70, %71, %cst_68 {dimension_numbers = #tpu.dot_dimension_numbers<[1], [0], [0], [1], [0, 0, 1, 1], [], []>} : vector<16x48xf32>, vector<48x8xf32>, vector<16x8xf32> -> vector<16x8xf32>
    %c0_69 = arith.constant 0 : index
    %c0_70 = arith.constant 0 : index
    %73 = vector.load %arg3[%c0_69, %c0_70] : memref<1x8xf32, #tpu.memory_space<vmem>>, vector<1x8xf32>
    %74 = vector.broadcast %73 : vector<1x8xf32> to vector<16x8xf32>
    %75 = arith.addf %72, %74 : vector<16x8xf32>
    %cst_71 = arith.constant 0.000000e+00 : f32
    %76 = vector.broadcast %cst_71 : f32 to vector<16x8xf32>
    %77 = arith.maximumf %75, %76 : vector<16x8xf32>
    %cst_72 = arith.constant dense<0.000000e+00> : vector<16xf32>
    %78 = vector.multi_reduction <add>, %77, %cst_72 [1] : vector<16x8xf32> to vector<16xf32>
    %79 = vector.shape_cast %78 : vector<16xf32> to vector<16x1xf32>
    %cst_73 = arith.constant 8.000000e+00 : f32
    %80 = vector.broadcast %cst_73 : f32 to vector<16x1xf32>
    %81 = arith.divf %79, %80 : vector<16x1xf32>
    %c0_74 = arith.constant 0 : index
    %c0_75 = arith.constant 0 : index
    %82 = vector.load %arg4[%c0_74, %c0_75] : memref<16x128xf32, #tpu.memory_space<vmem>>, vector<16x128xf32>
    %cst_76 = arith.constant dense<0.000000e+00> : vector<16x128xf32>
    %83 = tpu.matmul %68, %82, %cst_76 {dimension_numbers = #tpu.dot_dimension_numbers<[1], [0], [0], [1], [0, 0, 1, 1], [], []>} : vector<16x16xf32>, vector<16x128xf32>, vector<16x128xf32> -> vector<16x128xf32>
    %c0_77 = arith.constant 0 : index
    %c0_78 = arith.constant 0 : index
    %84 = vector.load %arg6[%c0_77, %c0_78] : memref<1x128xf32, #tpu.memory_space<vmem>>, vector<1x128xf32>
    %85 = vector.broadcast %84 : vector<1x128xf32> to vector<16x128xf32>
    %86 = arith.addf %83, %85 : vector<16x128xf32>
    %c0_79 = arith.constant 0 : index
    %c0_80 = arith.constant 0 : index
    %87 = vector.load %arg5[%c0_79, %c0_80] : memref<32x128xf32, #tpu.memory_space<vmem>>, vector<32x128xf32>
    %c0_81 = arith.constant 0 : index
    %c0_82 = arith.constant 0 : index
    %88 = vector.load %arg7[%c0_81, %c0_82] : memref<8x4xf32, #tpu.memory_space<vmem>>, vector<8x4xf32>
    %89 = tpu.iota {dimensions = array<i32: 1>} : vector<2x128xi32>
    %c64_i32 = arith.constant 64 : i32
    %90 = vector.broadcast %c64_i32 : i32 to vector<2x128xi32>
    %91 = arith.cmpi sge, %89, %90 : vector<2x128xi32>
    %c96_i32 = arith.constant 96 : i32
    %92 = vector.broadcast %c96_i32 : i32 to vector<2x128xi32>
    %93 = arith.cmpi slt, %89, %92 : vector<2x128xi32>
    %94 = arith.andi %91, %93 : vector<2x128xi1>
    %cst_83 = arith.constant 0.000000e+00 : f32
    %95 = vector.broadcast %cst_83 : f32 to vector<2x32xf32>
    %cst_84 = arith.constant 0.000000e+00 : f32
    %96 = vector.broadcast %cst_84 : f32 to vector<2x32xf32>
    %cst_85 = arith.constant 0.000000e+00 : f32
    %97 = vector.broadcast %cst_85 : f32 to vector<2x4xf32>
    %c0_86 = arith.constant 0 : index
    %c0_87 = arith.constant 0 : index
    %98 = vector.load %arg8[%c0_86, %c0_87] : memref<1x4xf32, #tpu.memory_space<vmem>>, vector<1x4xf32>
    %99 = vector.broadcast %98 : vector<1x4xf32> to vector<2x4xf32>
    %100 = arith.addf %97, %99 : vector<2x4xf32>
    %101 = vector.extract_strided_slice %86 {offsets = [0, 0], sizes = [2, 128], strides = [1, 1]} : vector<16x128xf32> to vector<2x128xf32>
    %cst_88 = arith.constant dense<0.000000e+00> : vector<2x128xf32>
    %102 = tpu.matmul %95, %87, %cst_88 {dimension_numbers = #tpu.dot_dimension_numbers<[1], [0], [0], [1], [0, 0, 1, 1], [], []>} : vector<2x32xf32>, vector<32x128xf32>, vector<2x128xf32> -> vector<2x128xf32>
    %103 = arith.addf %101, %102 : vector<2x128xf32>
    %104 = math.tanh %103 : vector<2x128xf32>
    %105 = arith.negf %103 : vector<2x128xf32>
    %106 = math.exp %105 : vector<2x128xf32>
    %cst_89 = arith.constant 1.000000e+00 : f32
    %107 = vector.broadcast %cst_89 : f32 to vector<2x128xf32>
    %108 = arith.addf %107, %106 : vector<2x128xf32>
    %109 = arith.divf %107, %108 : vector<2x128xf32>
    %110 = arith.select %94, %104, %109 : vector<2x128xi1>, vector<2x128xf32>
    %111 = vector.extract_strided_slice %110 {offsets = [0, 0], sizes = [2, 32], strides = [1, 1]} : vector<2x128xf32> to vector<2x32xf32>
    %112 = vector.extract_strided_slice %110 {offsets = [0, 32], sizes = [2, 32], strides = [1, 1]} : vector<2x128xf32> to vector<2x32xf32>
    %113 = vector.extract_strided_slice %110 {offsets = [0, 64], sizes = [2, 32], strides = [1, 1]} : vector<2x128xf32> to vector<2x32xf32>
    %114 = vector.extract_strided_slice %110 {offsets = [0, 96], sizes = [2, 32], strides = [1, 1]} : vector<2x128xf32> to vector<2x32xf32>
    %115 = arith.mulf %112, %96 : vector<2x32xf32>
    %116 = arith.mulf %111, %113 : vector<2x32xf32>
    %117 = arith.addf %115, %116 : vector<2x32xf32>
    %118 = math.tanh %117 : vector<2x32xf32>
    %119 = arith.mulf %114, %118 : vector<2x32xf32>
    %cst_90 = arith.constant dense<0.000000e+00> : vector<2xf32>
    %120 = vector.multi_reduction <add>, %119, %cst_90 [1] : vector<2x32xf32> to vector<2xf32>
    %121 = vector.shape_cast %120 : vector<2xf32> to vector<2x1xf32>
    %122 = vector.extract_strided_slice %81 {offsets = [0, 0], sizes = [2, 1], strides = [1, 1]} : vector<16x1xf32> to vector<2x1xf32>
    %123 = arith.mulf %121, %122 : vector<2x1xf32>
    %124 = vector.extract_strided_slice %88 {offsets = [0, 0], sizes = [1, 4], strides = [1, 1]} : vector<8x4xf32> to vector<1x4xf32>
    %125 = vector.broadcast %123 : vector<2x1xf32> to vector<2x4xf32>
    %126 = vector.broadcast %124 : vector<1x4xf32> to vector<2x4xf32>
    %127 = arith.mulf %125, %126 : vector<2x4xf32>
    %128 = arith.addf %100, %127 : vector<2x4xf32>
    %129 = vector.extract_strided_slice %86 {offsets = [2, 0], sizes = [2, 128], strides = [1, 1]} : vector<16x128xf32> to vector<2x128xf32>
    %cst_91 = arith.constant dense<0.000000e+00> : vector<2x128xf32>
    %130 = tpu.matmul %119, %87, %cst_91 {dimension_numbers = #tpu.dot_dimension_numbers<[1], [0], [0], [1], [0, 0, 1, 1], [], []>} : vector<2x32xf32>, vector<32x128xf32>, vector<2x128xf32> -> vector<2x128xf32>
    %131 = arith.addf %129, %130 : vector<2x128xf32>
    %132 = math.tanh %131 : vector<2x128xf32>
    %133 = arith.negf %131 : vector<2x128xf32>
    %134 = math.exp %133 : vector<2x128xf32>
    %cst_92 = arith.constant 1.000000e+00 : f32
    %135 = vector.broadcast %cst_92 : f32 to vector<2x128xf32>
    %136 = arith.addf %135, %134 : vector<2x128xf32>
    %137 = arith.divf %135, %136 : vector<2x128xf32>
    %138 = arith.select %94, %132, %137 : vector<2x128xi1>, vector<2x128xf32>
    %139 = vector.extract_strided_slice %138 {offsets = [0, 0], sizes = [2, 32], strides = [1, 1]} : vector<2x128xf32> to vector<2x32xf32>
    %140 = vector.extract_strided_slice %138 {offsets = [0, 32], sizes = [2, 32], strides = [1, 1]} : vector<2x128xf32> to vector<2x32xf32>
    %141 = vector.extract_strided_slice %138 {offsets = [0, 64], sizes = [2, 32], strides = [1, 1]} : vector<2x128xf32> to vector<2x32xf32>
    %142 = vector.extract_strided_slice %138 {offsets = [0, 96], sizes = [2, 32], strides = [1, 1]} : vector<2x128xf32> to vector<2x32xf32>
    %143 = arith.mulf %140, %117 : vector<2x32xf32>
    %144 = arith.mulf %139, %141 : vector<2x32xf32>
    %145 = arith.addf %143, %144 : vector<2x32xf32>
    %146 = math.tanh %145 : vector<2x32xf32>
    %147 = arith.mulf %142, %146 : vector<2x32xf32>
    %cst_93 = arith.constant dense<0.000000e+00> : vector<2xf32>
    %148 = vector.multi_reduction <add>, %147, %cst_93 [1] : vector<2x32xf32> to vector<2xf32>
    %149 = vector.shape_cast %148 : vector<2xf32> to vector<2x1xf32>
    %150 = vector.extract_strided_slice %81 {offsets = [2, 0], sizes = [2, 1], strides = [1, 1]} : vector<16x1xf32> to vector<2x1xf32>
    %151 = arith.mulf %149, %150 : vector<2x1xf32>
    %152 = vector.extract_strided_slice %88 {offsets = [1, 0], sizes = [1, 4], strides = [1, 1]} : vector<8x4xf32> to vector<1x4xf32>
    %153 = vector.broadcast %151 : vector<2x1xf32> to vector<2x4xf32>
    %154 = vector.broadcast %152 : vector<1x4xf32> to vector<2x4xf32>
    %155 = arith.mulf %153, %154 : vector<2x4xf32>
    %156 = arith.addf %128, %155 : vector<2x4xf32>
    %157 = vector.extract_strided_slice %86 {offsets = [4, 0], sizes = [2, 128], strides = [1, 1]} : vector<16x128xf32> to vector<2x128xf32>
    %cst_94 = arith.constant dense<0.000000e+00> : vector<2x128xf32>
    %158 = tpu.matmul %147, %87, %cst_94 {dimension_numbers = #tpu.dot_dimension_numbers<[1], [0], [0], [1], [0, 0, 1, 1], [], []>} : vector<2x32xf32>, vector<32x128xf32>, vector<2x128xf32> -> vector<2x128xf32>
    %159 = arith.addf %157, %158 : vector<2x128xf32>
    %160 = math.tanh %159 : vector<2x128xf32>
    %161 = arith.negf %159 : vector<2x128xf32>
    %162 = math.exp %161 : vector<2x128xf32>
    %cst_95 = arith.constant 1.000000e+00 : f32
    %163 = vector.broadcast %cst_95 : f32 to vector<2x128xf32>
    %164 = arith.addf %163, %162 : vector<2x128xf32>
    %165 = arith.divf %163, %164 : vector<2x128xf32>
    %166 = arith.select %94, %160, %165 : vector<2x128xi1>, vector<2x128xf32>
    %167 = vector.extract_strided_slice %166 {offsets = [0, 0], sizes = [2, 32], strides = [1, 1]} : vector<2x128xf32> to vector<2x32xf32>
    %168 = vector.extract_strided_slice %166 {offsets = [0, 32], sizes = [2, 32], strides = [1, 1]} : vector<2x128xf32> to vector<2x32xf32>
    %169 = vector.extract_strided_slice %166 {offsets = [0, 64], sizes = [2, 32], strides = [1, 1]} : vector<2x128xf32> to vector<2x32xf32>
    %170 = vector.extract_strided_slice %166 {offsets = [0, 96], sizes = [2, 32], strides = [1, 1]} : vector<2x128xf32> to vector<2x32xf32>
    %171 = arith.mulf %168, %145 : vector<2x32xf32>
    %172 = arith.mulf %167, %169 : vector<2x32xf32>
    %173 = arith.addf %171, %172 : vector<2x32xf32>
    %174 = math.tanh %173 : vector<2x32xf32>
    %175 = arith.mulf %170, %174 : vector<2x32xf32>
    %cst_96 = arith.constant dense<0.000000e+00> : vector<2xf32>
    %176 = vector.multi_reduction <add>, %175, %cst_96 [1] : vector<2x32xf32> to vector<2xf32>
    %177 = vector.shape_cast %176 : vector<2xf32> to vector<2x1xf32>
    %178 = vector.extract_strided_slice %81 {offsets = [4, 0], sizes = [2, 1], strides = [1, 1]} : vector<16x1xf32> to vector<2x1xf32>
    %179 = arith.mulf %177, %178 : vector<2x1xf32>
    %180 = vector.extract_strided_slice %88 {offsets = [2, 0], sizes = [1, 4], strides = [1, 1]} : vector<8x4xf32> to vector<1x4xf32>
    %181 = vector.broadcast %179 : vector<2x1xf32> to vector<2x4xf32>
    %182 = vector.broadcast %180 : vector<1x4xf32> to vector<2x4xf32>
    %183 = arith.mulf %181, %182 : vector<2x4xf32>
    %184 = arith.addf %156, %183 : vector<2x4xf32>
    %185 = vector.extract_strided_slice %86 {offsets = [6, 0], sizes = [2, 128], strides = [1, 1]} : vector<16x128xf32> to vector<2x128xf32>
    %cst_97 = arith.constant dense<0.000000e+00> : vector<2x128xf32>
    %186 = tpu.matmul %175, %87, %cst_97 {dimension_numbers = #tpu.dot_dimension_numbers<[1], [0], [0], [1], [0, 0, 1, 1], [], []>} : vector<2x32xf32>, vector<32x128xf32>, vector<2x128xf32> -> vector<2x128xf32>
    %187 = arith.addf %185, %186 : vector<2x128xf32>
    %188 = math.tanh %187 : vector<2x128xf32>
    %189 = arith.negf %187 : vector<2x128xf32>
    %190 = math.exp %189 : vector<2x128xf32>
    %cst_98 = arith.constant 1.000000e+00 : f32
    %191 = vector.broadcast %cst_98 : f32 to vector<2x128xf32>
    %192 = arith.addf %191, %190 : vector<2x128xf32>
    %193 = arith.divf %191, %192 : vector<2x128xf32>
    %194 = arith.select %94, %188, %193 : vector<2x128xi1>, vector<2x128xf32>
    %195 = vector.extract_strided_slice %194 {offsets = [0, 0], sizes = [2, 32], strides = [1, 1]} : vector<2x128xf32> to vector<2x32xf32>
    %196 = vector.extract_strided_slice %194 {offsets = [0, 32], sizes = [2, 32], strides = [1, 1]} : vector<2x128xf32> to vector<2x32xf32>
    %197 = vector.extract_strided_slice %194 {offsets = [0, 64], sizes = [2, 32], strides = [1, 1]} : vector<2x128xf32> to vector<2x32xf32>
    %198 = vector.extract_strided_slice %194 {offsets = [0, 96], sizes = [2, 32], strides = [1, 1]} : vector<2x128xf32> to vector<2x32xf32>
    %199 = arith.mulf %196, %173 : vector<2x32xf32>
    %200 = arith.mulf %195, %197 : vector<2x32xf32>
    %201 = arith.addf %199, %200 : vector<2x32xf32>
    %202 = math.tanh %201 : vector<2x32xf32>
    %203 = arith.mulf %198, %202 : vector<2x32xf32>
    %cst_99 = arith.constant dense<0.000000e+00> : vector<2xf32>
    %204 = vector.multi_reduction <add>, %203, %cst_99 [1] : vector<2x32xf32> to vector<2xf32>
    %205 = vector.shape_cast %204 : vector<2xf32> to vector<2x1xf32>
    %206 = vector.extract_strided_slice %81 {offsets = [6, 0], sizes = [2, 1], strides = [1, 1]} : vector<16x1xf32> to vector<2x1xf32>
    %207 = arith.mulf %205, %206 : vector<2x1xf32>
    %208 = vector.extract_strided_slice %88 {offsets = [3, 0], sizes = [1, 4], strides = [1, 1]} : vector<8x4xf32> to vector<1x4xf32>
    %209 = vector.broadcast %207 : vector<2x1xf32> to vector<2x4xf32>
    %210 = vector.broadcast %208 : vector<1x4xf32> to vector<2x4xf32>
    %211 = arith.mulf %209, %210 : vector<2x4xf32>
    %212 = arith.addf %184, %211 : vector<2x4xf32>
    %213 = vector.extract_strided_slice %86 {offsets = [8, 0], sizes = [2, 128], strides = [1, 1]} : vector<16x128xf32> to vector<2x128xf32>
    %cst_100 = arith.constant dense<0.000000e+00> : vector<2x128xf32>
    %214 = tpu.matmul %203, %87, %cst_100 {dimension_numbers = #tpu.dot_dimension_numbers<[1], [0], [0], [1], [0, 0, 1, 1], [], []>} : vector<2x32xf32>, vector<32x128xf32>, vector<2x128xf32> -> vector<2x128xf32>
    %215 = arith.addf %213, %214 : vector<2x128xf32>
    %216 = math.tanh %215 : vector<2x128xf32>
    %217 = arith.negf %215 : vector<2x128xf32>
    %218 = math.exp %217 : vector<2x128xf32>
    %cst_101 = arith.constant 1.000000e+00 : f32
    %219 = vector.broadcast %cst_101 : f32 to vector<2x128xf32>
    %220 = arith.addf %219, %218 : vector<2x128xf32>
    %221 = arith.divf %219, %220 : vector<2x128xf32>
    %222 = arith.select %94, %216, %221 : vector<2x128xi1>, vector<2x128xf32>
    %223 = vector.extract_strided_slice %222 {offsets = [0, 0], sizes = [2, 32], strides = [1, 1]} : vector<2x128xf32> to vector<2x32xf32>
    %224 = vector.extract_strided_slice %222 {offsets = [0, 32], sizes = [2, 32], strides = [1, 1]} : vector<2x128xf32> to vector<2x32xf32>
    %225 = vector.extract_strided_slice %222 {offsets = [0, 64], sizes = [2, 32], strides = [1, 1]} : vector<2x128xf32> to vector<2x32xf32>
    %226 = vector.extract_strided_slice %222 {offsets = [0, 96], sizes = [2, 32], strides = [1, 1]} : vector<2x128xf32> to vector<2x32xf32>
    %227 = arith.mulf %224, %201 : vector<2x32xf32>
    %228 = arith.mulf %223, %225 : vector<2x32xf32>
    %229 = arith.addf %227, %228 : vector<2x32xf32>
    %230 = math.tanh %229 : vector<2x32xf32>
    %231 = arith.mulf %226, %230 : vector<2x32xf32>
    %cst_102 = arith.constant dense<0.000000e+00> : vector<2xf32>
    %232 = vector.multi_reduction <add>, %231, %cst_102 [1] : vector<2x32xf32> to vector<2xf32>
    %233 = vector.shape_cast %232 : vector<2xf32> to vector<2x1xf32>
    %234 = vector.extract_strided_slice %81 {offsets = [8, 0], sizes = [2, 1], strides = [1, 1]} : vector<16x1xf32> to vector<2x1xf32>
    %235 = arith.mulf %233, %234 : vector<2x1xf32>
    %236 = vector.extract_strided_slice %88 {offsets = [4, 0], sizes = [1, 4], strides = [1, 1]} : vector<8x4xf32> to vector<1x4xf32>
    %237 = vector.broadcast %235 : vector<2x1xf32> to vector<2x4xf32>
    %238 = vector.broadcast %236 : vector<1x4xf32> to vector<2x4xf32>
    %239 = arith.mulf %237, %238 : vector<2x4xf32>
    %240 = arith.addf %212, %239 : vector<2x4xf32>
    %241 = vector.extract_strided_slice %86 {offsets = [10, 0], sizes = [2, 128], strides = [1, 1]} : vector<16x128xf32> to vector<2x128xf32>
    %cst_103 = arith.constant dense<0.000000e+00> : vector<2x128xf32>
    %242 = tpu.matmul %231, %87, %cst_103 {dimension_numbers = #tpu.dot_dimension_numbers<[1], [0], [0], [1], [0, 0, 1, 1], [], []>} : vector<2x32xf32>, vector<32x128xf32>, vector<2x128xf32> -> vector<2x128xf32>
    %243 = arith.addf %241, %242 : vector<2x128xf32>
    %244 = math.tanh %243 : vector<2x128xf32>
    %245 = arith.negf %243 : vector<2x128xf32>
    %246 = math.exp %245 : vector<2x128xf32>
    %cst_104 = arith.constant 1.000000e+00 : f32
    %247 = vector.broadcast %cst_104 : f32 to vector<2x128xf32>
    %248 = arith.addf %247, %246 : vector<2x128xf32>
    %249 = arith.divf %247, %248 : vector<2x128xf32>
    %250 = arith.select %94, %244, %249 : vector<2x128xi1>, vector<2x128xf32>
    %251 = vector.extract_strided_slice %250 {offsets = [0, 0], sizes = [2, 32], strides = [1, 1]} : vector<2x128xf32> to vector<2x32xf32>
    %252 = vector.extract_strided_slice %250 {offsets = [0, 32], sizes = [2, 32], strides = [1, 1]} : vector<2x128xf32> to vector<2x32xf32>
    %253 = vector.extract_strided_slice %250 {offsets = [0, 64], sizes = [2, 32], strides = [1, 1]} : vector<2x128xf32> to vector<2x32xf32>
    %254 = vector.extract_strided_slice %250 {offsets = [0, 96], sizes = [2, 32], strides = [1, 1]} : vector<2x128xf32> to vector<2x32xf32>
    %255 = arith.mulf %252, %229 : vector<2x32xf32>
    %256 = arith.mulf %251, %253 : vector<2x32xf32>
    %257 = arith.addf %255, %256 : vector<2x32xf32>
    %258 = math.tanh %257 : vector<2x32xf32>
    %259 = arith.mulf %254, %258 : vector<2x32xf32>
    %cst_105 = arith.constant dense<0.000000e+00> : vector<2xf32>
    %260 = vector.multi_reduction <add>, %259, %cst_105 [1] : vector<2x32xf32> to vector<2xf32>
    %261 = vector.shape_cast %260 : vector<2xf32> to vector<2x1xf32>
    %262 = vector.extract_strided_slice %81 {offsets = [10, 0], sizes = [2, 1], strides = [1, 1]} : vector<16x1xf32> to vector<2x1xf32>
    %263 = arith.mulf %261, %262 : vector<2x1xf32>
    %264 = vector.extract_strided_slice %88 {offsets = [5, 0], sizes = [1, 4], strides = [1, 1]} : vector<8x4xf32> to vector<1x4xf32>
    %265 = vector.broadcast %263 : vector<2x1xf32> to vector<2x4xf32>
    %266 = vector.broadcast %264 : vector<1x4xf32> to vector<2x4xf32>
    %267 = arith.mulf %265, %266 : vector<2x4xf32>
    %268 = arith.addf %240, %267 : vector<2x4xf32>
    %269 = vector.extract_strided_slice %86 {offsets = [12, 0], sizes = [2, 128], strides = [1, 1]} : vector<16x128xf32> to vector<2x128xf32>
    %cst_106 = arith.constant dense<0.000000e+00> : vector<2x128xf32>
    %270 = tpu.matmul %259, %87, %cst_106 {dimension_numbers = #tpu.dot_dimension_numbers<[1], [0], [0], [1], [0, 0, 1, 1], [], []>} : vector<2x32xf32>, vector<32x128xf32>, vector<2x128xf32> -> vector<2x128xf32>
    %271 = arith.addf %269, %270 : vector<2x128xf32>
    %272 = math.tanh %271 : vector<2x128xf32>
    %273 = arith.negf %271 : vector<2x128xf32>
    %274 = math.exp %273 : vector<2x128xf32>
    %cst_107 = arith.constant 1.000000e+00 : f32
    %275 = vector.broadcast %cst_107 : f32 to vector<2x128xf32>
    %276 = arith.addf %275, %274 : vector<2x128xf32>
    %277 = arith.divf %275, %276 : vector<2x128xf32>
    %278 = arith.select %94, %272, %277 : vector<2x128xi1>, vector<2x128xf32>
    %279 = vector.extract_strided_slice %278 {offsets = [0, 0], sizes = [2, 32], strides = [1, 1]} : vector<2x128xf32> to vector<2x32xf32>
    %280 = vector.extract_strided_slice %278 {offsets = [0, 32], sizes = [2, 32], strides = [1, 1]} : vector<2x128xf32> to vector<2x32xf32>
    %281 = vector.extract_strided_slice %278 {offsets = [0, 64], sizes = [2, 32], strides = [1, 1]} : vector<2x128xf32> to vector<2x32xf32>
    %282 = vector.extract_strided_slice %278 {offsets = [0, 96], sizes = [2, 32], strides = [1, 1]} : vector<2x128xf32> to vector<2x32xf32>
    %283 = arith.mulf %280, %257 : vector<2x32xf32>
    %284 = arith.mulf %279, %281 : vector<2x32xf32>
    %285 = arith.addf %283, %284 : vector<2x32xf32>
    %286 = math.tanh %285 : vector<2x32xf32>
    %287 = arith.mulf %282, %286 : vector<2x32xf32>
    %cst_108 = arith.constant dense<0.000000e+00> : vector<2xf32>
    %288 = vector.multi_reduction <add>, %287, %cst_108 [1] : vector<2x32xf32> to vector<2xf32>
    %289 = vector.shape_cast %288 : vector<2xf32> to vector<2x1xf32>
    %290 = vector.extract_strided_slice %81 {offsets = [12, 0], sizes = [2, 1], strides = [1, 1]} : vector<16x1xf32> to vector<2x1xf32>
    %291 = arith.mulf %289, %290 : vector<2x1xf32>
    %292 = vector.extract_strided_slice %88 {offsets = [6, 0], sizes = [1, 4], strides = [1, 1]} : vector<8x4xf32> to vector<1x4xf32>
    %293 = vector.broadcast %291 : vector<2x1xf32> to vector<2x4xf32>
    %294 = vector.broadcast %292 : vector<1x4xf32> to vector<2x4xf32>
    %295 = arith.mulf %293, %294 : vector<2x4xf32>
    %296 = arith.addf %268, %295 : vector<2x4xf32>
    %297 = vector.extract_strided_slice %86 {offsets = [14, 0], sizes = [2, 128], strides = [1, 1]} : vector<16x128xf32> to vector<2x128xf32>
    %cst_109 = arith.constant dense<0.000000e+00> : vector<2x128xf32>
    %298 = tpu.matmul %287, %87, %cst_109 {dimension_numbers = #tpu.dot_dimension_numbers<[1], [0], [0], [1], [0, 0, 1, 1], [], []>} : vector<2x32xf32>, vector<32x128xf32>, vector<2x128xf32> -> vector<2x128xf32>
    %299 = arith.addf %297, %298 : vector<2x128xf32>
    %300 = math.tanh %299 : vector<2x128xf32>
    %301 = arith.negf %299 : vector<2x128xf32>
    %302 = math.exp %301 : vector<2x128xf32>
    %cst_110 = arith.constant 1.000000e+00 : f32
    %303 = vector.broadcast %cst_110 : f32 to vector<2x128xf32>
    %304 = arith.addf %303, %302 : vector<2x128xf32>
    %305 = arith.divf %303, %304 : vector<2x128xf32>
    %306 = arith.select %94, %300, %305 : vector<2x128xi1>, vector<2x128xf32>
    %307 = vector.extract_strided_slice %306 {offsets = [0, 0], sizes = [2, 32], strides = [1, 1]} : vector<2x128xf32> to vector<2x32xf32>
    %308 = vector.extract_strided_slice %306 {offsets = [0, 32], sizes = [2, 32], strides = [1, 1]} : vector<2x128xf32> to vector<2x32xf32>
    %309 = vector.extract_strided_slice %306 {offsets = [0, 64], sizes = [2, 32], strides = [1, 1]} : vector<2x128xf32> to vector<2x32xf32>
    %310 = vector.extract_strided_slice %306 {offsets = [0, 96], sizes = [2, 32], strides = [1, 1]} : vector<2x128xf32> to vector<2x32xf32>
    %311 = arith.mulf %308, %285 : vector<2x32xf32>
    %312 = arith.mulf %307, %309 : vector<2x32xf32>
    %313 = arith.addf %311, %312 : vector<2x32xf32>
    %314 = math.tanh %313 : vector<2x32xf32>
    %315 = arith.mulf %310, %314 : vector<2x32xf32>
    %cst_111 = arith.constant dense<0.000000e+00> : vector<2xf32>
    %316 = vector.multi_reduction <add>, %315, %cst_111 [1] : vector<2x32xf32> to vector<2xf32>
    %317 = vector.shape_cast %316 : vector<2xf32> to vector<2x1xf32>
    %318 = vector.extract_strided_slice %81 {offsets = [14, 0], sizes = [2, 1], strides = [1, 1]} : vector<16x1xf32> to vector<2x1xf32>
    %319 = arith.mulf %317, %318 : vector<2x1xf32>
    %320 = vector.extract_strided_slice %88 {offsets = [7, 0], sizes = [1, 4], strides = [1, 1]} : vector<8x4xf32> to vector<1x4xf32>
    %321 = vector.broadcast %319 : vector<2x1xf32> to vector<2x4xf32>
    %322 = vector.broadcast %320 : vector<1x4xf32> to vector<2x4xf32>
    %323 = arith.mulf %321, %322 : vector<2x4xf32>
    %324 = arith.addf %296, %323 : vector<2x4xf32>
    %cst_112 = arith.constant dense<0xFF800000> : vector<2xf32>
    %325 = vector.multi_reduction <maximumf>, %324, %cst_112 [1] : vector<2x4xf32> to vector<2xf32>
    %326 = vector.shape_cast %325 : vector<2xf32> to vector<2x1xf32>
    %327 = vector.broadcast %326 : vector<2x1xf32> to vector<2x4xf32>
    %328 = arith.subf %324, %327 : vector<2x4xf32>
    %329 = math.exp %328 : vector<2x4xf32>
    %cst_113 = arith.constant dense<0.000000e+00> : vector<2xf32>
    %330 = vector.multi_reduction <add>, %329, %cst_113 [1] : vector<2x4xf32> to vector<2xf32>
    %331 = vector.shape_cast %330 : vector<2xf32> to vector<2x1xf32>
    %332 = vector.broadcast %331 : vector<2x1xf32> to vector<2x4xf32>
    %333 = arith.divf %329, %332 : vector<2x4xf32>
    %c0_114 = arith.constant 0 : index
    %c0_115 = arith.constant 0 : index
    %334 = vector.load %arg9[%c0_114, %c0_115] : memref<2x4xf32, #tpu.memory_space<vmem>>, vector<2x4xf32>
    tpu.vector_store %arg9[%c0_114, %c0_115], %333 {strides = array<i32>} : memref<2x4xf32, #tpu.memory_space<vmem>>, vector<2x4xf32>,
    return
  }
}

</mosaic_0001>

<bundles_post_ra>
// kernel: my_model_forward.1
= control target key start
LH: loop header
LB: loop body
LE: loop exit
PB: predicated region body
PF: predicated region fallthrough
CT: control target
= control target key end

     0   :  { %14 = vsyncpa [#allocation5], 0  ;;  %s2169_s0 = inlined_call_operand.vmem [shape: s32[2,8], index: 0, kind: input, shape index: {}]   ;;  %s2170_s1 = inlined_call_operand.vmem [shape: f32[20,16], index: 1, kind: input, shape index: {}]   ;;  %s2171_s2 = inlined_call_operand.vmem [shape: f32[48,8], index: 2, kind: input, shape index: {}]   ;;  %s2172_s3 = inlined_call_operand.vmem [shape: f32[1,8], index: 3, kind: input, shape index: {}]   ;;  %s2173_s4 = inlined_call_operand.vmem [shape: f32[16,128], index: 4, kind: input, shape index: {}]   ;;  %s2174_s5 = inlined_call_operand.vmem [shape: f32[32,128], index: 5, kind: input, shape index: {}]   ;;  %s2175_s6 = inlined_call_operand.vmem [shape: f32[1,128], index: 6, kind: input, shape index: {}]   ;;  %s2176_s7 = inlined_call_operand.vmem [shape: f32[8,4], index: 7, kind: input, shape index: {}]   ;;  %s2177_s8 = inlined_call_operand.vmem [shape: f32[1,4], index: 8, kind: input, shape index: {}]   ;;  %s2178_s9 = inlined_call_operand.hbm [shape: f32[2,4], index: 9, kind: output, shape index: {}]  }
   0x1   :  { %15 = vsyncpa [#allocation4], 0  ;;  %s22_s11 = sshll.u32 %s2169_s0, 4  ;;  %s23_s11 = int_to_ptr.vmem [resolvable:$true] %s22_s11 }
   0x2   :  { %s1720_s12 = scalar_lea.vmem %s23_s11, 32  ;;  %p1725_p1 = scmp.lt.s32.totalorder %s23_s11, %s23_s11 }
   0x3   :  { %p1721_p0 = scmp.ne.s32.totalorder %s23_s11, %s1720_s12  ;;  %p1726_p2 = scmp.lt.s32.totalorder %s1720_s12, %s1720_s12 }
   0x5   :  { %p1727_p3 = por %p1726_p2, %p1725_p1 }
   0x7   :  { %p1728_p4 = pnand %p1727_p3, %p1721_p0 }
   0x9   :  { %1731 = shalt.err (!%p1728_p4)
}
   0xa   :  { %s1758_s13 = smov [#allocation3]  }
   0xb   :  { %25 = dma.vmem_to_smem %s23_s11, 32, %s1758_s13, [#allocation5]  }
   0xc   :  { %1754 = dma.done.wait [#allocation5], 32  }
   0xd   :  { %1755 = vsyncadd [#allocation5], 4294967264 }
   0xe   :  { %45 = sfence }
   0xf   :  { %v258_v0 = vld [vmem:[%s2173_s4] sm:$0xff]  ;;  %v259_v1 = vld [vmem:[%s2173_s4 + $0x8] sm:$0xff]  ;;  %vm46_vm0 = vcmask 130048   ;;  %s51_s0 = sld [smem:[#allocation3]]  ;;  %v1759_v3 = vmov 0.0   ;;  %s1382_s19 = sld [smem:[#allocation3 + $0x1]]  ;;  %v351_v45 = vlaneseq }
  0x10   :  { %v1592_v2 = vpack.c.bf16 %v259_v1, %v258_v0  ;;  %47 = vst.msk [vmem:[#allocation2] sm:$0xff] %vm46_vm0, %v1759_v3  ;;  %48 = vst.msk [vmem:[#allocation2 + $0x8] sm:$0xff] %vm46_vm0, %v1759_v3  ;;  %s1381_s18 = sld [smem:[#allocation3 + $0x80]]  ;;  %s1383_s20 = sld [smem:[#allocation3 + $0x81]]  ;;  %vm49_vm1 = vcmask 125952   ;;  %vm54_vm2 = vcmask 122880  }
  0x11   :  { %s1384_s21 = sld [smem:[#allocation3 + $0x2]]  ;;  %s1831_s23 = sld [smem:[#allocation3 + $0x3]]  ;;  %50 = vst.msk [vmem:[#allocation2 + $0x10] sm:$0xf] %vm49_vm1, %v1759_v3  ;;  %v1760_v4 = vmov 0.0|0.0   ;;  %v346_v23 = vld [vmem:[%s2174_s5] sm:$0xff] }
  0x12   :  { %1593 = vmatprep.subr.bf16.mxu1 %v1592_v2  ;;  %s1829_s22 = sld [smem:[#allocation3 + $0x82]]  ;;  %s1834_s4 = sld [smem:[#allocation3 + $0x83]]  ;;  %v347_v24 = vld [vmem:[%s2174_s5 + $0x8] sm:$0xff]  ;;  %vm122_vm3 = vcmask 1045504   ;;  %v348_v31 = vld [vmem:[%s2174_s5 + $0x10] sm:$0xff]  ;;  %v349_v32 = vld [vmem:[%s2174_s5 + $0x18] sm:$0xff] }
  0x13   :  { %1595 = vmatpush3.bf16.msra.mxu1 %v1592_v2  ;;  %s1836_s24 = sld [smem:[#allocation3 + $0x4]]  ;;  %s1840_s26 = sld [smem:[#allocation3 + $0x5]]  ;;  %v1928_v29 = vpack.c.bf16 %v347_v24, %v346_v23  ;;  %v1942_v34 = vpack.c.bf16 %v349_v32, %v348_v31  ;;  %vm1761_vm4 = vmmov 0   ;;  %v1399_v35 = vld [vmem:[%s2175_s6] ss:$0 sm:$0xff]  ;;  %v352_v47 = vand.u32 127, %v351_v45 }
  0x14   :  { %s1838_s25 = sld [smem:[#allocation3 + $0x84]]  ;;  %1596 = vmatprep.subr.bf16.mxu1 %v1760_v4  ;;  %s1846_s30 = sld [smem:[#allocation3 + $0x85]]  ;;  %vm134_vm8 = vcmask 1043456   ;;  %v151_v62 = vld [vmem:[%s2171_s2] sm:$0xff]  ;;  %v152_v63 = vld [vmem:[%s2171_s2 + $0x8] sm:$0xff]  ;;  %v153_v0 = vld [vmem:[%s2171_s2 + $0x10] sm:$0xff] }
  0x15   :  { %s52_s29 = scalar_lea.vmem %s2170_s1, %s51_s0  ;;  %s61_s15 = scalar_lea.vmem %s2170_s1, %s1382_s19  ;;  %vm353_vm5 = vcmp.ge.s32.totalorder %v352_v47, 64  ;;  %vm354_vm6 = vcmp.lt.s32.totalorder %v352_v47, 96  ;;  %v1580_v1 = vpack.c.bf16 %v152_v63, %v151_v62  ;;  %v154_v2 = vld [vmem:[%s2171_s2 + $0x18] sm:$0xff]  ;;  %vm148_vm9 = vcmask 261120  }
  0x16   :  { %v53_v5 = vld [vmem:[%s52_s29] sm:$0x1]  ;;  %s57_s12 = scalar_lea.vmem %s2170_s1, %s1381_s18  ;;  %s65_s0 = scalar_lea.vmem %s2170_s1, %s1383_s20  ;;  %vm1965_vm7 = vmand %vm353_vm5, %vm354_vm6  ;;  %vm164_vm10 = vcmask 392192   ;;  %vm248_vm11 = vcmask 64512   ;;  %vm711_vm12 = vcmask 259076   ;;  %vm586_vm13 = vcmask 257026  }
  0x17   :  { %55 = vst.msk [vmem:[#allocation2 + $0x2] sm:$0x1] %vm54_vm2, %v53_v5  ;;  %v58_v6 = vld [vmem:[%s57_s12] sm:$0x1]  ;;  %s69_s29 = scalar_lea.vmem %s2170_s1, %s1384_s21  ;;  %s77_s20 = scalar_lea.vmem %s2170_s1, %s1831_s23  ;;  %v1584_v5 = vpack.c.bf16 %v154_v2, %v153_v0  ;;  %1581 = vmatprep.subr.bf16.mxu0 %v1580_v1  ;;  %vm467_vm14 = vcmask 254976   ;;  %vm836_vm15 = vcmask 261126  }
  0x18   :  { %v62_v7 = vld [vmem:[%s61_s15] sm:$0x1]  ;;  %59 = vst.msk [vmem:[#allocation2 + $0x3] sm:$0x1] %vm54_vm2, %v58_v6  ;;  %s73_s10 = scalar_lea.vmem %s2170_s1, %s1829_s22  ;;  %s81_s14 = scalar_lea.vmem %s2170_s1, %s1834_s4  ;;  %1583 = vmatpush3.bf16.msra.mxu0 %v1580_v1 }
  0x19   :  { %63 = vst.msk [vmem:[#allocation2 + $0x4] sm:$0x1] %vm54_vm2, %v62_v7  ;;  %v66_v8 = vld [vmem:[%s65_s0] sm:$0x1]  ;;  %s85_s17 = scalar_lea.vmem %s2170_s1, %s1836_s24  ;;  %s1392_s19 = sld [smem:[#allocation3 + $0x6]]  ;;  %v156_v7 = vld [vmem:[%s2171_s2 + $0x28] sm:$0xff]  ;;  %1585 = vmatprep.subr.bf16.mxu0 %v1584_v5 }
  0x1a   :  { %v70_v9 = vld [vmem:[%s69_s29] sm:$0x1]  ;;  %67 = vst.msk [vmem:[#allocation2 + $0x5] sm:$0x1] %vm54_vm2, %v66_v8  ;;  %s89_s0 = scalar_lea.vmem %s2170_s1, %s1838_s25  ;;  %s93_s29 = scalar_lea.vmem %s2170_s1, %s1840_s26 }
  0x1b   :  { %71 = vst.msk [vmem:[#allocation2 + $0x6] sm:$0x1] %vm54_vm2, %v70_v9  ;;  %v74_v10 = vld [vmem:[%s73_s10] sm:$0x1]  ;;  %s97_s18 = scalar_lea.vmem %s2170_s1, %s1846_s30  ;;  %s1393_s25 = sld [smem:[#allocation3 + $0x86]] }
  0x1c   :  { %v78_v11 = vld [vmem:[%s77_s20] sm:$0x1]  ;;  %75 = vst.msk [vmem:[#allocation2 + $0x7] sm:$0x1] %vm54_vm2, %v74_v10  ;;  %s1394_s10 = sld [smem:[#allocation3 + $0x7]]  ;;  %s1762_s6 = smov 64   ;;  %1587 = vmatpush3.bf16.msra.mxu0 %v1584_v5 }
  0x1d   :  { %79 = vst.msk [vmem:[#allocation2 + $0x8] sm:$0x1] %vm54_vm2, %v78_v11  ;;  %v82_v12 = vld [vmem:[%s81_s14] sm:$0x1]  ;;  %s1395_s26 = sld [smem:[#allocation3 + $0x87]] }
  0x1e   :  { %v86_v13 = vld [vmem:[%s85_s17] sm:$0x1]  ;;  %83 = vst.msk [vmem:[#allocation2 + $0x9] sm:$0x1] %vm54_vm2, %v82_v12 }
  0x1f   :  { %87 = vst.msk [vmem:[#allocation2 + $0xa] sm:$0x1] %vm54_vm2, %v86_v13  ;;  %v90_v14 = vld [vmem:[%s89_s0] sm:$0x1]  ;;  %s101_s20 = scalar_lea.vmem %s2170_s1, %s1392_s19 }
  0x20   :  { %v94_v15 = vld [vmem:[%s93_s29] sm:$0x1]  ;;  %91 = vst.msk [vmem:[#allocation2 + $0xb] sm:$0x1] %vm54_vm2, %v90_v14 }
  0x21   :  { %95 = vst.msk [vmem:[#allocation2 + $0xc] sm:$0x1] %vm54_vm2, %v94_v15  ;;  %v98_v16 = vld [vmem:[%s97_s18] sm:$0x1]  ;;  %s105_s30 = scalar_lea.vmem %s2170_s1, %s1393_s25  ;;  %s1763_s25 = smov 32  }
  0x22   :  { %99 = vst.msk [vmem:[#allocation2 + $0xd] sm:$0x1] %vm54_vm2, %v98_v16  ;;  %v102_v17 = vld [vmem:[%s101_s20] sm:$0x1]  ;;  %s109_s16 = scalar_lea.vmem %s2170_s1, %s1394_s10  ;;  %s1764_s10 = smov 16  }
  0x23   :  { %103 = vst.msk [vmem:[#allocation2 + $0xe] sm:$0x1] %vm54_vm2, %v102_v17  ;;  %v106_v18 = vld [vmem:[%s105_s30] sm:$0x1]  ;;  %s113_s23 = scalar_lea.vmem %s2170_s1, %s1395_s26 }
  0x24   :  { %v110_v19 = vld [vmem:[%s109_s16] sm:$0x1]  ;;  %107 = vst.msk [vmem:[#allocation2 + $0xf] sm:$0x1] %vm54_vm2, %v106_v18 }
  0x25   :  { %111 = vst.msk [vmem:[#allocation2 + $0x10] sm:$0x1] %vm54_vm2, %v110_v19  ;;  %v114_v20 = vld [vmem:[%s113_s23] sm:$0x1] }
  0x26   :  { %115 = vst.msk [vmem:[#allocation2 + $0x11] sm:$0x1] %vm54_vm2, %v114_v20  ;;  %v1916_v21 = vld [vmem:[#allocation2] sm:$0xff] }
  0x27   :  { %v123_v22 = vrot.slane %v1916_v21, 2  ;;  %v135_v54 = vrot.slane %v1916_v21, 4  ;;  %v155_v6 = vld [vmem:[%s2171_s2 + $0x20] sm:$0xff] }
  0x28   :  { %v1588_v8 = vpack.c.bf16 %v156_v7, %v155_v6 }
  0x2a   :  { %1589 = vmatprep.subr.bf16.mxu0 %v1588_v8 }
  0x2b   :  { %v1925_v25 = vld [vmem:[#allocation2 + $0x8] sm:$0xff]  ;;  %1591 = vmatpush3.bf16.msra.mxu0 %v1588_v8 }
  0x2c   :  { %v124_v26 = vrot.slane %v1925_v25, 2  ;;  %v136_v55 = vrot.slane %v1925_v25, 4  ;;  %1602 = vmatprep.subr.bf16.mxu0 %v1760_v4 }
  0x2d   :  { %v118_v27 = vld [vmem:[#allocation2 + $0x10] sm:$0xf] }
  0x2e   :  { %v126_v28 = vrot.slane %v118_v27, 2  ;;  %v1930_v30 = vsel %vm122_vm3, %v123_v22, %v124_v26  ;;  %v137_v56 = vsel %vm134_vm8, %v135_v54, %v136_v55  ;;  %v138_v57 = vrot.slane %v118_v27, 4 }
  0x2f   :  { %1489 = vmatprep.mubr.msk.f32.mxu1 %vm46_vm0, %v1930_v30 }
  0x30   :  { %v127_v33 = vsel %vm122_vm3, %v124_v26, %v126_v28  ;;  %v139_v58 = vsel %vm134_vm8, %v136_v55, %v138_v57 }
  0x31   :  { %1490 = vmatmul.mubr.msk.f32.vlgmr.msra.gmra.mrb[0].mxu1 %vm46_vm0, %v127_v33 }
  0x32   :  { %1598 = vmatpush3.bf16.msra.mxu1 %v1928_v29  ;;  %1500 = vmatprep.mubr.msk.f32.mxu1 %vm1761_vm4, %v1759_v3 }
  0x33   :  { %1599 = vmatprep.subr.bf16.mxu1 %v1760_v4 }
  0x36   :  { %1601 = vmatpush3.bf16.msra.mxu1 %v1942_v34 }
  0x37   :  { %1608 = vmatprep.subr.bf16.mxu1 %v1760_v4 }
  0x39   :  { %1501 = vmatmul.mubr.f32.vlgmr.msra.gmra.mrb[2].mxu1 %v1759_v3 }
  0x3a   :  { %1610 = vmatpush3.bf16.msra.mxu1 %v1928_v29  ;;  %1522 = vmatprep.mubr.msk.f32.mxu1 %vm1761_vm4, %v1759_v3 }
  0x3b   :  { %1611 = vmatprep.subr.bf16.mxu1 %v1760_v4 }
  0x3e   :  { %1613 = vmatpush3.bf16.msra.mxu1 %v1942_v34 }
  0x3f   :  { %1620 = vmatprep.subr.bf16.mxu1 %v1760_v4 }
 0x104   :  { %v1491_v36 = vpop.f32.mrb[0].mxu1 }
 0x105   :  { %v1959_v37 = vadd.f32 %v1491_v36, %v1399_v35  ;;  %v337_v38 = vpop.f32.mrb[1].mxu1 }
 0x106   :  { %v1961_v39 = vadd.f32 %v1399_v35, %v337_v38 }
 0x10c   :  { %v433_v40 = vpop.f32.mrb[2].mxu1 }
 0x10d   :  { %v437_v41 = vadd.f32 %v433_v40, %v1961_v39  ;;  %v1502_v42 = vpop.f32.mrb[3].mxu1 }
 0x10f   :  { %v1403_v43 = vmul.f32 -1.442695, %v437_v41 }
 0x111   :  { %1652 = vpow2.f32 %v1403_v43 }
 0x112   :  { %1654 = vtanh.f32 %v437_v41 }
 0x11b   :  { %v1653_v44 = vpop.eup %1652 }
 0x11c   :  { %v442_v46 = vadd.f32 1.0, %v1653_v44  ;;  %v1655_v49 = vpop.eup %1654 }
 0x11e   :  { %1656 = vrcp.f32 %v442_v46 }
 0x128   :  { %v1657_v50 = vpop.eup %1656 }
 0x129   :  { %v445_v51 = vsel %vm1965_vm7, %v1655_v49, %v1657_v50 }
 0x12a   :  { %448 = vrot.lane.b32.xlu0 %v445_v51, %s1762_s6  ;;  %v446_v59 = vmul.f32 0.0, %v445_v51 }
 0x19c   :  { %v449_v52 = vpop.permute.xlu0 %448 }
 0x19d   :  { %v451_v53 = vmul.f32 %v449_v52, %v445_v51 }
 0x19f   :  { %453 = vrot.lane.b32.xlu0 %v451_v53, %s1763_s25 }
 0x1a3   :  { %130 = vrot.lane.b32.xlu0 %v127_v33, %s1764_s10 }
 0x1a7   :  { %142 = vrot.lane.b32.xlu0 %v139_v58, %s1763_s25 }
 0x211   :  { %v454_v60 = vpop.permute.xlu0 %453 }
 0x212   :  { %v1977_v61 = vadd.f32 %v454_v60, %v446_v59 }
 0x214   :  { %1658 = vtanh.f32 %v1977_v61  ;;  %v563_v43 = vrot.slane %v1977_v61, 6 }
 0x215   :  { %v131_v10 = vpop.permute.xlu0 %130 }
 0x216   :  { %v147_v14 = vsel %vm46_vm0, %v1925_v25, %v131_v10 }
 0x219   :  { %v143_v15 = vpop.permute.xlu0 %142 }
 0x21a   :  { %v150_v18 = vsel %vm148_vm9, %v147_v14, %v143_v15 }
 0x21e   :  { %v1659_v9 = vpop.eup %1658 }
 0x21f   :  { %459 = vrot.lane.b32.xlu1 %v1659_v9, %s1762_s6 }
 0x223   :  { %128 = vrot.lane.b32.xlu1 %v1930_v30, %s1764_s10 }
 0x227   :  { %140 = vrot.lane.b32.xlu1 %v137_v56, %s1763_s25 }
 0x291   :  { %v460_v11 = vpop.permute.xlu1 %459 }
 0x292   :  { %v462_v12 = vmul.f32 %v460_v11, %v445_v51 }
 0x294   :  { %464 = vrot.lane.b32.xlu1 %v462_v12, %s1763_s25 }
 0x295   :  { %v129_v13 = vpop.permute.xlu1 %128 }
 0x296   :  { %v146_v16 = vsel %vm46_vm0, %v1916_v21, %v129_v13  ;;  %v2029_v21 = vld [vmem:[%s2172_s3] ss:$0 sm:$0xff]  ;;  %vm1337_vm0 = vcmask 25600  }
 0x299   :  { %v141_v17 = vpop.permute.xlu1 %140 }
 0x29a   :  { %v149_v19 = vsel %vm148_vm9, %v146_v16, %v141_v17 }
 0x29b   :  { %1482 = vmatprep.mubr.msk.f32.mxu0 %vm164_vm10, %v149_v19 }
 0x29c   :  { %1483 = vmatmul.mubr.msk.f32.vlgmr.msra.gmra.mrb[0].mxu0 %vm164_vm10, %v150_v18 }
 0x29d   :  { %1604 = vmatpush3.bf16.msra.mxu0 %v1928_v29  ;;  %1511 = vmatprep.mubr.msk.f32.mxu0 %vm1761_vm4, %v1759_v3 }
 0x29e   :  { %1605 = vmatprep.subr.bf16.mxu0 %v1760_v4 }
 0x2a1   :  { %1607 = vmatpush3.bf16.msra.mxu0 %v1942_v34 }
 0x2a2   :  { %1614 = vmatprep.subr.bf16.mxu0 %v1760_v4 }
 0x306   :  { %v2016_v20 = vpop.permute.xlu1 %464 }
 0x307   :  { %1512 = vmatmul.mubr.msk.f32.vlgmr.msra.gmra.mrb[2].mxu0 %vm148_vm9, %v2016_v20 }
 0x308   :  { %1616 = vmatpush3.bf16.msra.mxu0 %v1928_v29  ;;  %1533 = vmatprep.mubr.msk.f32.mxu0 %vm1761_vm4, %v1759_v3 }
 0x309   :  { %1617 = vmatprep.subr.bf16.mxu0 %v1760_v4 }
 0x30c   :  { %1619 = vmatpush3.bf16.msra.mxu0 %v1942_v34 }
 0x30d   :  { %1626 = vmatprep.subr.bf16.mxu0 %v1760_v4 }
 0x36f   :  { %v1484_v22 = vpop.f32.mrb[0].mxu0 }
 0x370   :  { %v243_v23 = vadd.f32 %v1484_v22, %v2029_v21  ;;  %v2032_v24 = vpop.f32.mrb[1].mxu0 }
 0x372   :  { %v247_v25 = vmax.f32 %v243_v23, 0.0 }
 0x374   :  { %v2035_v26 = vsel %vm248_vm11, %v247_v25, 0.0 }
 0x3da   :  { %v546_v27 = vpop.f32.mrb[2].mxu0 }
 0x3db   :  { %v551_v28 = vrot.slane %v546_v27, 6  ;;  %v1513_v30 = vpop.f32.mrb[3].mxu0 }
 0x3dd   :  { %v553_v31 = vadd.f32 %v551_v28, %v1961_v39 }
 0x3df   :  { %v1405_v32 = vmul.f32 -1.442695, %v553_v31 }
 0x3e1   :  { %1660 = vpow2.f32 %v1405_v32 }
 0x3e2   :  { %1662 = vtanh.f32 %v553_v31 }
 0x3eb   :  { %v1661_v33 = vpop.eup %1660 }
 0x3ec   :  { %v558_v35 = vadd.f32 1.0, %v1661_v33  ;;  %v1663_v36 = vpop.eup %1662 }
 0x3ee   :  { %1664 = vrcp.f32 %v558_v35 }
 0x3f8   :  { %v1665_v38 = vpop.eup %1664 }
 0x3f9   :  { %v561_v40 = vsel %vm1965_vm7, %v1663_v36, %v1665_v38 }
 0x3fa   :  { %567 = vrot.lane.b32.xlu0 %v561_v40, %s1762_s6  ;;  %v565_v44 = vmul.f32 %v563_v43, %v561_v40 }
 0x46c   :  { %v568_v41 = vpop.permute.xlu0 %567 }
 0x46d   :  { %v570_v42 = vmul.f32 %v568_v41, %v561_v40 }
 0x46f   :  { %572 = vrot.lane.b32.xlu1 %v570_v42, %s1763_s25 }
 0x4e1   :  { %v573_v46 = vpop.permute.xlu1 %572 }
 0x4e2   :  { %v575_v47 = vadd.f32 %v573_v46, %v565_v44 }
 0x4e4   :  { %1666 = vtanh.f32 %v575_v47  ;;  %v688_v2 = vrot.slane %v575_v47, 6 }
 0x4ee   :  { %v1667_v49 = vpop.eup %1666 }
 0x4ef   :  { %578 = vrot.lane.b32.xlu0 %v1667_v49, %s1762_s6 }
 0x561   :  { %v579_v50 = vpop.permute.xlu0 %578 }
 0x562   :  { %v2044_v51 = vmul.f32 %v579_v50, %v561_v40 }
 0x564   :  { %v600_v52 = vrot.slane %v2044_v51, 2 }
 0x566   :  { %601 = vrot.lane.b32.xlu1 %v600_v52, %s1763_s25 }
 0x5d8   :  { %v602_v53 = vpop.permute.xlu1 %601 }
 0x5d9   :  { %1523 = vmatmul.mubr.msk.f32.vlgmr.msra.gmra.mrb[4].mxu1 %vm148_vm9, %v602_v53 }
 0x5da   :  { %1622 = vmatpush3.bf16.msra.mxu1 %v1928_v29  ;;  %1544 = vmatprep.mubr.msk.f32.mxu1 %vm1761_vm4, %v1759_v3 }
 0x5db   :  { %1623 = vmatprep.subr.bf16.mxu1 %v1760_v4 }
 0x5de   :  { %1625 = vmatpush3.bf16.msra.mxu1 %v1942_v34 }
 0x5df   :  { %1632 = vmatprep.subr.bf16.mxu1 %v1760_v4 }
 0x6ac   :  { %v671_v54 = vpop.f32.mrb[4].mxu1 }
 0x6ad   :  { %v676_v55 = vrot.slane %v671_v54, 4  ;;  %v1524_v56 = vpop.f32.mrb[5].mxu1 }
 0x6af   :  { %v678_v57 = vadd.f32 %v676_v55, %v1961_v39 }
 0x6b1   :  { %v1407_v58 = vmul.f32 -1.442695, %v678_v57 }
 0x6b3   :  { %1668 = vpow2.f32 %v1407_v58 }
 0x6b4   :  { %1670 = vtanh.f32 %v678_v57 }
 0x6bd   :  { %v1669_v59 = vpop.eup %1668 }
 0x6be   :  { %v683_v60 = vadd.f32 1.0, %v1669_v59  ;;  %v1671_v61 = vpop.eup %1670 }
 0x6c0   :  { %1672 = vrcp.f32 %v683_v60 }
 0x6ca   :  { %v1673_v62 = vpop.eup %1672 }
 0x6cb   :  { %v686_v63 = vsel %vm1965_vm7, %v1671_v61, %v1673_v62 }
 0x6cc   :  { %692 = vrot.lane.b32.xlu0 %v686_v63, %s1762_s6  ;;  %v690_v5 = vmul.f32 %v688_v2, %v686_v63 }
 0x73e   :  { %v693_v0 = vpop.permute.xlu0 %692 }
 0x73f   :  { %v695_v1 = vmul.f32 %v693_v0, %v686_v63 }
 0x741   :  { %697 = vrot.lane.b32.xlu1 %v695_v1, %s1763_s25 }
 0x7b3   :  { %v698_v6 = vpop.permute.xlu1 %697 }
 0x7b4   :  { %v700_v7 = vadd.f32 %v698_v6, %v690_v5 }
 0x7b6   :  { %1674 = vtanh.f32 %v700_v7  ;;  %v813_v30 = vrot.slane %v700_v7, 6 }
 0x7c0   :  { %v1675_v8 = vpop.eup %1674 }
 0x7c1   :  { %703 = vrot.lane.b32.xlu0 %v1675_v8, %s1762_s6 }
 0x833   :  { %v704_v9 = vpop.permute.xlu0 %703 }
 0x834   :  { %v2061_v10 = vmul.f32 %v704_v9, %v686_v63 }
 0x836   :  { %v725_v11 = vrot.slane %v2061_v10, 4 }
 0x838   :  { %726 = vrot.lane.b32.xlu1 %v725_v11, %s1763_s25 }
 0x8aa   :  { %v727_v12 = vpop.permute.xlu1 %726 }
 0x8ab   :  { %1534 = vmatmul.mubr.msk.f32.vlgmr.msra.gmra.mrb[4].mxu0 %vm148_vm9, %v727_v12 }
 0x8ac   :  { %1628 = vmatpush3.bf16.msra.mxu0 %v1928_v29  ;;  %1555 = vmatprep.mubr.msk.f32.mxu0 %vm1761_vm4, %v1759_v3 }
 0x8ad   :  { %1629 = vmatprep.subr.bf16.mxu0 %v1760_v4 }
 0x8b0   :  { %1631 = vmatpush3.bf16.msra.mxu0 %v1942_v34 }
 0x8b1   :  { %1638 = vmatprep.subr.bf16.mxu0 %v1760_v4 }
 0x97e   :  { %v796_v13 = vpop.f32.mrb[4].mxu0 }
 0x97f   :  { %v801_v14 = vrot.slane %v796_v13, 2  ;;  %v1535_v15 = vpop.f32.mrb[5].mxu0 }
 0x981   :  { %v803_v16 = vadd.f32 %v801_v14, %v1961_v39 }
 0x983   :  { %v1409_v17 = vmul.f32 -1.442695, %v803_v16 }
 0x985   :  { %1676 = vpow2.f32 %v1409_v17 }
 0x986   :  { %1678 = vtanh.f32 %v803_v16 }
 0x98f   :  { %v1677_v18 = vpop.eup %1676 }
 0x990   :  { %v808_v19 = vadd.f32 1.0, %v1677_v18  ;;  %v1679_v22 = vpop.eup %1678 }
 0x992   :  { %1680 = vrcp.f32 %v808_v19 }
 0x99c   :  { %v1681_v23 = vpop.eup %1680 }
 0x99d   :  { %v811_v25 = vsel %vm1965_vm7, %v1679_v22, %v1681_v23 }
 0x99e   :  { %817 = vrot.lane.b32.xlu0 %v811_v25, %s1762_s6  ;;  %v815_v31 = vmul.f32 %v813_v30, %v811_v25 }
 0xa10   :  { %v818_v27 = vpop.permute.xlu0 %817 }
 0xa11   :  { %v820_v28 = vmul.f32 %v818_v27, %v811_v25 }
 0xa13   :  { %822 = vrot.lane.b32.xlu1 %v820_v28, %s1763_s25 }
 0xa85   :  { %v823_v39 = vpop.permute.xlu1 %822 }
 0xa86   :  { %v825_v32 = vadd.f32 %v823_v39, %v815_v31 }
 0xa88   :  { %1682 = vtanh.f32 %v825_v32  ;;  %v935_v55 = vrot.slane %v825_v32, 6 }
 0xa92   :  { %v1683_v33 = vpop.eup %1682 }
 0xa93   :  { %828 = vrot.lane.b32.xlu0 %v1683_v33, %s1762_s6 }
 0xb05   :  { %v829_v35 = vpop.permute.xlu0 %828 }
 0xb06   :  { %v2078_v36 = vmul.f32 %v829_v35, %v811_v25 }
 0xb08   :  { %v850_v38 = vrot.slane %v2078_v36, 6 }
 0xb0a   :  { %851 = vrot.lane.b32.xlu1 %v850_v38, %s1763_s25 }
 0xb7c   :  { %v852_v40 = vpop.permute.xlu1 %851 }
 0xb7d   :  { %1545 = vmatmul.mubr.msk.f32.vlgmr.msra.gmra.mrb[6].mxu1 %vm148_vm9, %v852_v40 }
 0xb7e   :  { %1634 = vmatpush3.bf16.msra.mxu1 %v1928_v29  ;;  %1566 = vmatprep.mubr.msk.f32.mxu1 %vm1761_vm4, %v1759_v3 }
 0xb7f   :  { %1635 = vmatprep.subr.bf16.mxu1 %v1760_v4 }
 0xb82   :  { %1637 = vmatpush3.bf16.msra.mxu1 %v1942_v34 }
 0xc50   :  { %v921_v41 = vpop.f32.mrb[6].mxu1 }
 0xc51   :  { %v925_v42 = vadd.f32 %v921_v41, %v1959_v37  ;;  %v1546_v43 = vpop.f32.mrb[7].mxu1 }
 0xc53   :  { %v1411_v44 = vmul.f32 -1.442695, %v925_v42 }
 0xc55   :  { %1684 = vpow2.f32 %v1411_v44 }
 0xc56   :  { %1686 = vtanh.f32 %v925_v42 }
 0xc5f   :  { %v1685_v46 = vpop.eup %1684 }
 0xc60   :  { %v930_v47 = vadd.f32 1.0, %v1685_v46  ;;  %v1687_v49 = vpop.eup %1686 }
 0xc62   :  { %1688 = vrcp.f32 %v930_v47 }
 0xc6c   :  { %v1689_v50 = vpop.eup %1688 }
 0xc6d   :  { %v933_v52 = vsel %vm1965_vm7, %v1687_v49, %v1689_v50 }
 0xc6e   :  { %939 = vrot.lane.b32.xlu0 %v933_v52, %s1762_s6  ;;  %v937_v56 = vmul.f32 %v935_v55, %v933_v52 }
 0xce0   :  { %v940_v53 = vpop.permute.xlu0 %939 }
 0xce1   :  { %v942_v54 = vmul.f32 %v940_v53, %v933_v52 }
 0xce3   :  { %944 = vrot.lane.b32.xlu1 %v942_v54, %s1763_s25 }
 0xd55   :  { %v945_v57 = vpop.permute.xlu1 %944 }
 0xd56   :  { %v947_v58 = vadd.f32 %v945_v57, %v937_v56 }
 0xd58   :  { %1690 = vtanh.f32 %v947_v58  ;;  %v1053_v9 = vrot.slane %v947_v58, 6 }
 0xd62   :  { %v1691_v59 = vpop.eup %1690 }
 0xd63   :  { %950 = vrot.lane.b32.xlu0 %v1691_v59, %s1762_s6 }
 0xdd5   :  { %v951_v60 = vpop.permute.xlu0 %950 }
 0xdd6   :  { %v953_v61 = vmul.f32 %v951_v60, %v933_v52 }
 0xdd8   :  { %955 = vrot.lane.b32.xlu1 %v953_v61, %s1763_s25 }
 0xe4a   :  { %v2095_v62 = vpop.permute.xlu1 %955 }
 0xe4b   :  { %1556 = vmatmul.mubr.msk.f32.vlgmr.msra.gmra.mrb[6].mxu0 %vm148_vm9, %v2095_v62 }
 0xe4c   :  { %1640 = vmatpush3.bf16.msra.mxu0 %v1928_v29  ;;  %1577 = vmatprep.mubr.msk.f32.mxu0 %vm1761_vm4, %v1759_v3 }
 0xe4d   :  { %1641 = vmatprep.subr.bf16.mxu0 %v1760_v4 }
 0xe50   :  { %1643 = vmatpush3.bf16.msra.mxu0 %v1942_v34 }
 0xf1e   :  { %v1036_v63 = vpop.f32.mrb[6].mxu0 }
 0xf1f   :  { %v1041_v0 = vrot.slane %v1036_v63, 6  ;;  %v1557_v1 = vpop.f32.mrb[7].mxu0 }
 0xf21   :  { %v1043_v2 = vadd.f32 %v1041_v0, %v1959_v37 }
 0xf23   :  { %v1413_v5 = vmul.f32 -1.442695, %v1043_v2 }
 0xf25   :  { %1692 = vpow2.f32 %v1413_v5 }
 0xf26   :  { %1694 = vtanh.f32 %v1043_v2 }
 0xf2f   :  { %v1693_v6 = vpop.eup %1692 }
 0xf30   :  { %v1048_v7 = vadd.f32 1.0, %v1693_v6  ;;  %v1695_v8 = vpop.eup %1694 }
 0xf32   :  { %1696 = vrcp.f32 %v1048_v7 }
 0xf3c   :  { %v1697_v29 = vpop.eup %1696 }
 0xf3d   :  { %v1051_v3 = vsel %vm1965_vm7, %v1695_v8, %v1697_v29 }
 0xf3e   :  { %1057 = vrot.lane.b32.xlu0 %v1051_v3, %s1762_s6  ;;  %v1055_v11 = vmul.f32 %v1053_v9, %v1051_v3 }
 0xfb0   :  { %v1058_v4 = vpop.permute.xlu0 %1057 }
 0xfb1   :  { %v1060_v34 = vmul.f32 %v1058_v4, %v1051_v3 }
 0xfb3   :  { %1062 = vrot.lane.b32.xlu1 %v1060_v34, %s1763_s25 }
0x1025   :  { %v1063_v12 = vpop.permute.xlu1 %1062 }
0x1026   :  { %v1065_v13 = vadd.f32 %v1063_v12, %v1055_v11  ;;  %v958_v11 = vsel %vm467_vm14, %v2095_v62, 0.0  ;;  %v350_v62 = vld [vmem:[%s2176_s7] sm:$0xff]  ;;  %s1765_s7 = smov [#allocation6]  }
0x1028   :  { %1698 = vtanh.f32 %v1065_v13  ;;  %v1177_v38 = vrot.slane %v1065_v13, 6 }
0x1032   :  { %v1699_v14 = vpop.eup %1698 }
0x1033   :  { %1068 = vrot.lane.b32.xlu0 %v1699_v14, %s1762_s6 }
0x10a5   :  { %v1069_v15 = vpop.permute.xlu0 %1068 }
0x10a6   :  { %v2110_v16 = vmul.f32 %v1069_v15, %v1051_v3  ;;  %v468_v3 = vsel %vm467_vm14, %v2016_v20, 0.0  ;;  %v473_v20 = vshrl.u32 %v351_v45, 7 }
0x10a8   :  { %v1089_v17 = vrot.slane %v2110_v16, 2 }
0x10aa   :  { %1090 = vrot.lane.b32.xlu1 %v1089_v17, %s1763_s25  ;;  %v593_v17 = vsub.s32 1, %v473_v20 }
0x111c   :  { %v1091_v18 = vpop.permute.xlu1 %1090 }
0x111d   :  { %1567 = vmatmul.mubr.msk.f32.vlgmr.msra.gmra.mrb[8].mxu1 %vm148_vm9, %v1091_v18 }
0x11f0   :  { %v1160_v19 = vpop.f32.mrb[8].mxu1 }
0x11f1   :  { %v1165_v22 = vrot.slane %v1160_v19, 4  ;;  %v1568_v23 = vpop.f32.mrb[9].mxu1 }
0x11f2   :  { %v594_v23 = vrot.slane %v350_v62, %v593_v17 }
0x11f3   :  { %v1167_v25 = vadd.f32 %v1165_v22, %v1959_v37  ;;  %v474_v22 = vsub.s32 0, %v473_v20 }
0x11f5   :  { %v1415_v27 = vmul.f32 -1.442695, %v1167_v25 }
0x11f7   :  { %1700 = vpow2.f32 %v1415_v27  ;;  %v718_v27 = vsub.s32 2, %v473_v20 }
0x11f8   :  { %1702 = vtanh.f32 %v1167_v25 }
0x1201   :  { %v1701_v28 = vpop.eup %1700 }
0x1202   :  { %v1172_v30 = vadd.f32 1.0, %v1701_v28  ;;  %v1703_v31 = vpop.eup %1702  ;;  %v475_v28 = vrot.slane %v350_v62, %v474_v22 }
0x1204   :  { %1704 = vrcp.f32 %v1172_v30 }
0x120e   :  { %v1705_v39 = vpop.eup %1704 }
0x120f   :  { %v1175_v32 = vsel %vm1965_vm7, %v1703_v31, %v1705_v39 }
0x1210   :  { %1181 = vrot.lane.b32.xlu0 %v1175_v32, %s1762_s6  ;;  %v1179_v40 = vmul.f32 %v1177_v38, %v1175_v32 }
0x1282   :  { %v1182_v33 = vpop.permute.xlu0 %1181 }
0x1283   :  { %v1184_v35 = vmul.f32 %v1182_v33, %v1175_v32  ;;  %v843_v33 = vsub.s32 3, %v473_v20 }
0x1285   :  { %1186 = vrot.lane.b32.xlu1 %v1184_v35, %s1763_s25  ;;  %v719_v35 = vrot.slane %v350_v62, %v718_v27 }
0x12f7   :  { %v1187_v41 = vpop.permute.xlu1 %1186 }
0x12f8   :  { %v1189_v42 = vadd.f32 %v1187_v41, %v1179_v40  ;;  %v1402_v40 = vld [vmem:[%s2177_s8] ss:$0 sm:$0xff]  ;;  %s1356_s8 = sshll.u32 %s1765_s7, 4  ;;  %s1357_s8 = int_to_ptr.vmem [resolvable:$true] %s1356_s8 }
0x12f9   :  { %s1732_s29 = scalar_lea.vmem %s1357_s8, 32  ;;  %p1737_p6 = scmp.lt.s32.totalorder %s1357_s8, %s1357_s8 }
0x12fa   :  { %1706 = vtanh.f32 %v1189_v42  ;;  %v1301_v1 = vrot.slane %v1189_v42, 6  ;;  %v844_v42 = vrot.slane %v350_v62, %v843_v33  ;;  %p1733_p5 = scmp.ne.s32.totalorder %s1357_s8, %s1732_s29  ;;  %p1738_p7 = scmp.lt.s32.totalorder %s1732_s29, %s1732_s29 }
0x12fc   :  { %p1739_p8 = por %p1738_p7, %p1737_p6 }
0x12fe   :  { %p1740_p9 = pnand %p1739_p8, %p1733_p5 }
0x1304   :  { %v1707_v43 = vpop.eup %1706 }
0x1305   :  { %1192 = vrot.lane.b32.xlu0 %v1707_v43, %s1762_s6 }
0x1377   :  { %v1193_v44 = vpop.permute.xlu0 %1192 }
0x1378   :  { %v1195_v46 = vmul.f32 %v1193_v44, %v1175_v32 }
0x137a   :  { %v1213_v47 = vrot.slane %v1195_v46, 4 }
0x137c   :  { %1214 = vrot.lane.b32.xlu1 %v1213_v47, %s1763_s25 }
0x13ee   :  { %v1215_v49 = vpop.permute.xlu1 %1214 }
0x13ef   :  { %1578 = vmatmul.mubr.msk.f32.vlgmr.msra.gmra.mrb[8].mxu0 %vm148_vm9, %v1215_v49 }
0x14c2   :  { %v1284_v50 = vpop.f32.mrb[8].mxu0 }
0x14c3   :  { %v1289_v52 = vrot.slane %v1284_v50, 2  ;;  %v1579_v53 = vpop.f32.mrb[9].mxu0 }
0x14c4   :  { %v964_v53 = vsub.s32 4, %v473_v20 }
0x14c5   :  { %v1291_v54 = vadd.f32 %v1289_v52, %v1959_v37  ;;  %v238_v37 = vadd.f32 %v2029_v21, %v2032_v24 }
0x14c7   :  { %v1417_v55 = vmul.f32 -1.442695, %v1291_v54  ;;  %v246_v0 = vmax.f32 %v238_v37, 0.0 }
0x14c9   :  { %1708 = vpow2.f32 %v1417_v55  ;;  %v249_v48 = vsel %vm248_vm11, %v246_v0, 0.0 }
0x14ca   :  { %1710 = vtanh.f32 %v1291_v54 }
0x14d3   :  { %v1709_v56 = vpop.eup %1708 }
0x14d4   :  { %v1296_v57 = vadd.f32 1.0, %v1709_v56  ;;  %v1711_v58 = vpop.eup %1710  ;;  %v1082_v56 = vsub.s32 5, %v473_v20 }
0x14d6   :  { %1712 = vrcp.f32 %v1296_v57  ;;  %v1206_v57 = vsub.s32 6, %v473_v20  ;;  %v1083_v0 = vrot.slane %v350_v62, %v1082_v56 }
0x14e0   :  { %v1713_v59 = vpop.eup %1712 }
0x14e1   :  { %v1299_v60 = vsel %vm1965_vm7, %v1711_v58, %v1713_v59 }
0x14e2   :  { %1305 = vrot.lane.b32.xlu0 %v1299_v60, %s1762_s6  ;;  %v1303_v2 = vmul.f32 %v1301_v1, %v1299_v60  ;;  %v1207_v1 = vrot.slane %v350_v62, %v1206_v57 }
0x1554   :  { %v1306_v61 = vpop.permute.xlu0 %1305 }
0x1555   :  { %v1308_v63 = vmul.f32 %v1306_v61, %v1299_v60 }
0x1557   :  { %1310 = vrot.lane.b32.xlu1 %v1308_v63, %s1763_s25  ;;  %v965_v63 = vrot.slane %v350_v62, %v964_v53 }
0x155b   :  { %583 = vrot.lane.b32.xlu1 %v2044_v51, %s1763_s25 }
0x155f   :  { %833 = vrot.lane.b32.xlu1 %v2078_v36, %s1763_s25 }
0x1563   :  { %1197 = vrot.lane.b32.xlu1 %v1195_v46, %s1763_s25 }
0x1587   :  { %250 = vadd.xlane.f32.xlu1 %v249_v48 }
0x15c9   :  { %v1311_v5 = vpop.permute.xlu1 %1310 }
0x15ca   :  { %v1313_v6 = vadd.f32 %v1311_v5, %v1303_v2 }
0x15cc   :  { %1714 = vtanh.f32 %v1313_v6 }
0x15d6   :  { %v1715_v7 = vpop.eup %1714 }
0x15d7   :  { %1316 = vrot.lane.b32.xlu0 %v1715_v7, %s1762_s6  ;;  %v1330_v7 = vsub.s32 7, %v473_v20 }
0x15db   :  { %708 = vrot.lane.b32.xlu0 %v2061_v10, %s1763_s25  ;;  %v584_v10 = vpop.permute.xlu1 %583 }
0x15dc   :  { %v587_v4 = vsel %vm586_vm13, %v584_v10, 0.0 }
0x15df   :  { %1073 = vrot.lane.b32.xlu0 %v2110_v16, %s1763_s25  ;;  %v834_v34 = vpop.permute.xlu1 %833 }
0x15e0   :  { %v837_v9 = vsel %vm836_vm15, %v834_v34, 0.0 }
0x15e3   :  { %v1198_v12 = vpop.permute.xlu1 %1197 }
0x1614   :  { %v251_v16 = vpop.xlane.xlu1 %250 }
0x1615   :  { %v256_v19 = vmul.f32 0.125, %v251_v16 }
0x1649   :  { %v1317_v51 = vpop.permute.xlu0 %1316 }
0x164a   :  { %v1319_v21 = vmul.f32 %v1317_v51, %v1299_v60 }
0x164c   :  { %1321 = vrot.lane.b32.xlu0 %v1319_v21, %s1763_s25 }
0x164d   :  { %v709_v24 = vpop.permute.xlu0 %708 }
0x164e   :  { %v712_v36 = vsel %vm711_vm12, %v709_v24, 0.0 }
0x164f   :  { %713 = vadd.xlane.f32.xlu1 %v712_v36  ;;  %v1331_v36 = vrot.slane %v350_v62, %v1330_v7 }
0x1651   :  { %v1074_v8 = vpop.permute.xlu0 %1073 }
0x1652   :  { %v1076_v29 = vsel %vm586_vm13, %v1074_v8, 0.0 }
0x1653   :  { %253 = vadd.xlane.f32.xlu1 %v2035_v26  ;;  %v1200_v26 = vsel %vm711_vm12, %v1198_v12, 0.0 }
0x1657   :  { %1077 = vadd.xlane.f32.xlu1 %v1076_v29 }
0x166b   :  { %469 = vadd.xlane.f32.xlu0 %v468_v3 }
0x166f   :  { %588 = vadd.xlane.f32.xlu0 %v587_v4 }
0x1673   :  { %838 = vadd.xlane.f32.xlu0 %v837_v9 }
0x1677   :  { %959 = vadd.xlane.f32.xlu0 %v958_v11 }
0x167b   :  { %1201 = vadd.xlane.f32.xlu0 %v1200_v26 }
0x16be   :  { %v1322_v13 = vpop.permute.xlu0 %1321 }
0x16bf   :  { %v1324_v14 = vsel %vm836_vm15, %v1322_v13, 0.0 }
0x16c0   :  { %1325 = vadd.xlane.f32.xlu1 %v1324_v14 }
0x16dc   :  { %v714_v31 = vpop.xlane.xlu1 %713 }
0x16dd   :  { %v715_v45 = vmul.f32 %v714_v31, %v256_v19 }
0x16df   :  { %v720_v47 = vmul.f32 %v719_v35, %v715_v45 }
0x16e0   :  { %v254_v44 = vpop.xlane.xlu1 %253 }
0x16e1   :  { %v722_v54 = vrot.slane %v720_v47, 4  ;;  %v257_v55 = vmul.f32 0.125, %v254_v44 }
0x16e4   :  { %v1078_v58 = vpop.xlane.xlu1 %1077 }
0x16e5   :  { %v1079_v48 = vmul.f32 %v1078_v58, %v257_v55 }
0x16e7   :  { %v1084_v51 = vmul.f32 %v1083_v0, %v1079_v48 }
0x16e9   :  { %v1086_v29 = vrot.slane %v1084_v51, 2 }
0x16f8   :  { %v470_v15 = vpop.xlane.xlu0 %469 }
0x16f9   :  { %v471_v30 = vmul.f32 %v470_v15, %v256_v19 }
0x16fb   :  { %v476_v38 = vmul.f32 %v475_v28, %v471_v30 }
0x16fc   :  { %v589_v18 = vpop.xlane.xlu0 %588 }
0x16fd   :  { %v590_v25 = vmul.f32 %v589_v18, %v256_v19  ;;  %v477_v49 = vadd.f32 %v1402_v40, %v476_v38 }
0x16ff   :  { %v595_v32 = vmul.f32 %v594_v23, %v590_v25 }
0x1700   :  { %v839_v39 = vpop.xlane.xlu0 %838 }
0x1701   :  { %v597_v41 = vrot.slane %v595_v32, 2  ;;  %v840_v43 = vmul.f32 %v839_v39, %v256_v19 }
0x1703   :  { %v599_v50 = vadd.f32 %v597_v41, %v477_v49  ;;  %v845_v52 = vmul.f32 %v844_v42, %v840_v43 }
0x1704   :  { %v960_v46 = vpop.xlane.xlu0 %959 }
0x1705   :  { %v724_v60 = vadd.f32 %v722_v54, %v599_v50  ;;  %v847_v61 = vrot.slane %v845_v52, 6  ;;  %v961_v37 = vmul.f32 %v960_v46, %v257_v55 }
0x1707   :  { %v849_v5 = vadd.f32 %v847_v61, %v724_v60  ;;  %v966_v6 = vmul.f32 %v965_v63, %v961_v37 }
0x1708   :  { %v1202_v59 = vpop.xlane.xlu0 %1201 }
0x1709   :  { %v1203_v2 = vmul.f32 %v1202_v59, %v257_v55  ;;  %v967_v24 = vadd.f32 %v966_v6, %v849_v5 }
0x170b   :  { %v1208_v21 = vmul.f32 %v1207_v1, %v1203_v2  ;;  %v1088_v34 = vadd.f32 %v1086_v29, %v967_v24 }
0x170d   :  { %v1210_v10 = vrot.slane %v1208_v21, 4 }
0x170f   :  { %v1212_v11 = vadd.f32 %v1210_v10, %v1088_v34 }
0x174d   :  { %v1326_v8 = vpop.xlane.xlu1 %1325 }
0x174e   :  { %v1327_v3 = vmul.f32 %v1326_v8, %v257_v55 }
0x1750   :  { %v1332_v4 = vmul.f32 %v1331_v36, %v1327_v3 }
0x1752   :  { %v1334_v9 = vrot.slane %v1332_v4, 6 }
0x1754   :  { %v1336_v12 = vadd.f32 %v1334_v9, %v1212_v11 }
0x1756   :  { %v1338_v26 = vsel %vm1337_vm0, %v1336_v12, -inf }
0x1757   :  { %1339 = vmax.xlane.f32.xlu0 %v1338_v26 }
0x17e4   :  { %v1340_v13 = vpop.xlane.xlu0 %1339 }
0x17e5   :  { %v1341_v14 = vsub.f32 %v1336_v12, %v1340_v13 }
0x17e7   :  { %v1342_v15 = vmul.f32 1.442695, %v1341_v14 }
0x17e9   :  { %1716 = vpow2.f32 %v1342_v15 }
0x17f3   :  { %v1717_v20 = vpop.eup %1716 }
0x17f4   :  { %v1344_v16 = vsel %vm1337_vm0, %v1717_v20, 0.0 }
0x17f5   :  { %1345 = vadd.xlane.f32.xlu1 %v1344_v16 }
0x1882   :  { %v1346_v17 = vpop.xlane.xlu1 %1345 }
0x1883   :  { %1718 = vrcp.f32 %v1346_v17 }
0x188d   :  { %v1719_v18 = vpop.eup %1718 }
0x188e   :  { %v1348_v19 = vmul.f32 %v1719_v18, %v1717_v20 }
0x1890   :  { %1349 = vst.msk [vmem:[#allocation6] sm:$0x3] %vm1337_vm0, %v1348_v19 }
0x1891   :  { %1743 = shalt.err (!%p1740_p9)
}
0x1892   :  { %s1744_s24 = scalar_lea.hbm %s2178_s9, 32 }
0x1893   :  { %p1745_p10 = scmp.ne.s32.totalorder %s2178_s9, %s1744_s24  ;;  %p1748_p11 = scmp.lt.u32.totalorder %s1744_s24, %s2178_s9 }
0x1895   :  { %p1750_p12 = pnand %p1748_p11, %p1745_p10 }
0x1897   :  { %1753 = shalt.err (!%p1750_p12)
}
0x1898   :  { %1359 = dma.vmem_to_hbm [thread:$0]  %s1357_s8, 32, %s2178_s9, [#allocation4]  }
0x1899   :  { %1756 = dma.done.wait [#allocation4], 32  }
0x189a   :  { %1757 = vsyncadd [#allocation4], 4294967264 }
0x189b   :  { %1363 = vsyncpa [#allocation4], 1 }
0x189c   :  { %1364 = vsyncpa [#allocation5], 1 }

</bundles_post_ra>
